<compile_context>
chip_gen: v5e
topology: v5e:2x2
jax: 0.10.0
libtpu: 0.0.40
codegen_flags: <defaults>
</compile_context>

<pallas_src>
import jax
import jax.numpy as jnp
from jax.experimental import pallas as pl
from jax.experimental.pallas import tpu as pltpu

# ---- synthetic config (small Llama-style decoder) ----
VOCAB = 128
HIDDEN = 32
N_HEADS = 4
HEAD_DIM = HIDDEN // N_HEADS
INTER = 64
N_LAYERS = 2
SEQ = 8
EPS = 1e-6
NEG_INF = -1e30


# ---------------- fused Pallas kernel (whole decoder stack) ----------------

def _fused_forward_kernel(ids_ref, embed_ref, rope_ref, ln_ref,
                          wqkv_ref, wgu_ref, wout_ref, o_ref, h_scr):
    """Full decoder stack for one sequence of the batch grid.

    ids_ref:   (B, S) int32   scalar-prefetch token ids (SMEM)
    embed_ref: (V, H)  f32    embedding table (VMEM resident)
    rope_ref:  (1, 2, S, H)   [cos; sin] per-head-tiled RoPE angles
    ln_ref:    (2L+1, 1, H)   [ln1_0, ln2_0, ..., final_norm]
    wqkv_ref:  (L, H, 5H) bf16  [scale*Wq | Wk | Wv | scale*Wq@R | Wk@R]
    wgu_ref:   (L, H, 2I) bf16  [Wgate | Wup]
    wout_ref:  (L, H+I, H) bf16 [Wo ; Wdown]
    o_ref:     (1, S, H) f32  output hidden states block
    h_scr:     (S, H) f32     VMEM scratch for the gathered embeddings
    """
    b = pl.program_id(0)

    # ---- fused embedding lookup (VocabParallelEmbedding) ----
    for s in range(SEQ):
        tok = ids_ref[b, s]
        h_scr[pl.ds(s, 1), :] = embed_ref[pl.ds(tok, 1), :]
    h = h_scr[...]                                           # (S, H) f32

    cos = rope_ref[0, 0]                                     # (S, H)
    sin = rope_ref[0, 1]

    # additive causal bias, built once and reused for every layer / head
    row = jax.lax.broadcasted_iota(jnp.int32, (SEQ, SEQ), 0)
    col = jax.lax.broadcasted_iota(jnp.int32, (SEQ, SEQ), 1)
    causal_bias = jnp.where(col <= row, 0.0, NEG_INF).astype(jnp.float32)
    causal_bias = causal_bias[None, :, :]                    # (1, S, S)

    def rms(x, w):
        var = jnp.mean(x * x, axis=-1, keepdims=True)
        return x * jax.lax.rsqrt(var + EPS) * w

    for l in range(N_LAYERS):
        # --- self attention block ---
        xn = rms(h, ln_ref[2 * l])                           # (S, H) f32
        qkv = jnp.dot(xn.astype(jnp.bfloat16), wqkv_ref[l],
                      preferred_element_type=jnp.float32)    # (S, 5H) f32
        qf = qkv[:, 0 * HIDDEN:1 * HIDDEN]
        kf = qkv[:, 1 * HIDDEN:2 * HIDDEN]
        v = qkv[:, 2 * HIDDEN:3 * HIDDEN]
        qr = qkv[:, 3 * HIDDEN:4 * HIDDEN]                   # = xn @ (scale*Wq@R)
        kr = qkv[:, 4 * HIDDEN:5 * HIDDEN]                   # = xn @ (Wk@R)

        # RoPE (rotate-half already folded into the weights; softmax scale
        # folded into the q columns)
        q = qf * cos + qr * sin
        k = kf * cos + kr * sin

        # batched per-head attention: (NH, S, HD) leading-head layout
        q3 = q.astype(jnp.bfloat16).reshape(SEQ, N_HEADS, HEAD_DIM).transpose(1, 0, 2)
        k3 = k.astype(jnp.bfloat16).reshape(SEQ, N_HEADS, HEAD_DIM).transpose(1, 0, 2)
        v3 = v.astype(jnp.bfloat16).reshape(SEQ, N_HEADS, HEAD_DIM).transpose(1, 0, 2)

        scores = jnp.einsum('hqd,hkd->hqk', q3, k3,
                            preferred_element_type=jnp.float32)   # (NH, S, S) f32
        scores = scores + causal_bias
        scores = scores - jnp.max(scores, axis=-1, keepdims=True)
        p = jnp.exp(scores)
        p = p / jnp.sum(p, axis=-1, keepdims=True)                # exact softmax

        attn = jnp.einsum('hqk,hkd->hqd', p.astype(jnp.bfloat16), v3,
                          preferred_element_type=jnp.float32)     # (NH, S, HD)
        attn = attn.transpose(1, 0, 2).reshape(SEQ, HIDDEN)       # (S, H)

        w_out_l = wout_ref[l]                                     # (H+I, H) bf16
        h = h + jnp.dot(attn.astype(jnp.bfloat16), w_out_l[:HIDDEN],
                        preferred_element_type=jnp.float32)

        # --- MLP block (SwiGLU) ---
        xn = rms(h, ln_ref[2 * l + 1])
        gu = jnp.dot(xn.astype(jnp.bfloat16), wgu_ref[l],
                     preferred_element_type=jnp.float32)          # (S, 2I) f32
        g = gu[:, :INTER]
        u = gu[:, INTER:]
        act = g * jax.nn.sigmoid(g) * u                           # SiLU(g) * up, f32
        h = h + jnp.dot(act.astype(jnp.bfloat16), w_out_l[HIDDEN:],
                        preferred_element_type=jnp.float32)

    o_ref[...] = rms(h, ln_ref[2 * N_LAYERS])[None, :, :]


# ---------------- JAX glue ----------------

def _rotate_half_matrix():
    """R such that x @ R == rotate_half(x) per head (block-diagonal, (H, H))."""
    half = HEAD_DIM // 2
    r = jnp.zeros((HEAD_DIM, HEAD_DIM), jnp.float32)
    r = r.at[jnp.arange(half) + half, jnp.arange(half)].set(-1.0)
    r = r.at[jnp.arange(half), jnp.arange(half) + half].set(1.0)
    return jnp.kron(jnp.eye(N_HEADS, dtype=jnp.float32), r)


def _rope_cos_sin(positions):
    """positions (B, S) int32 -> (B, 2, S, H) stacked [cos; sin], tiled per head."""
    inv_freq = 1.0 / (10000.0 ** (jnp.arange(0, HEAD_DIM, 2, dtype=jnp.float32)
                                  / HEAD_DIM))
    ang = positions.astype(jnp.float32)[..., None] * inv_freq        # (B, S, HD/2)
    cos = jnp.concatenate([jnp.cos(ang), jnp.cos(ang)], axis=-1)     # (B, S, HD)
    sin = jnp.concatenate([jnp.sin(ang), jnp.sin(ang)], axis=-1)
    cos = jnp.tile(cos, (1, 1, N_HEADS))                             # (B, S, H)
    sin = jnp.tile(sin, (1, 1, N_HEADS))
    return jnp.stack([cos, sin], axis=1)                             # (B, 2, S, H)


def init_params(key):
    def w(k, shape, scale=0.02):
        return scale * jax.random.normal(k, shape, dtype=jnp.float32)

    rot = _rotate_half_matrix()
    attn_scale = HEAD_DIM ** -0.5

    ln_list, wqkv_list, wgu_list, wout_list = [], [], [], []
    for layer_idx in range(N_LAYERS):
        lk = jax.random.fold_in(key, 100 + layer_idx)
        wq = w(jax.random.fold_in(lk, 1), (HIDDEN, HIDDEN))
        wk = w(jax.random.fold_in(lk, 2), (HIDDEN, HIDDEN))
        wv = w(jax.random.fold_in(lk, 3), (HIDDEN, HIDDEN))
        wo = w(jax.random.fold_in(lk, 4), (HIDDEN, HIDDEN))
        gate = w(jax.random.fold_in(lk, 5), (HIDDEN, INTER))
        up = w(jax.random.fold_in(lk, 6), (HIDDEN, INTER))
        down = w(jax.random.fold_in(lk, 7), (INTER, HIDDEN))

        # fold rotate-half and softmax scale into the fused QKV projection
        wqkv5 = jnp.concatenate(
            [wq * attn_scale, wk, wv, (wq @ rot) * attn_scale, wk @ rot], axis=1)
        wqkv_list.append(wqkv5)                                       # (H, 5H)
        wgu_list.append(jnp.concatenate([gate, up], axis=1))          # (H, 2I)
        wout_list.append(jnp.concatenate([wo, down], axis=0))         # (H+I, H)
        ln_list.append(jnp.ones((1, HIDDEN), jnp.float32))            # ln1
        ln_list.append(jnp.ones((1, HIDDEN), jnp.float32))            # ln2
    ln_list.append(jnp.ones((1, HIDDEN), jnp.float32))                # final norm

    return {
        "embed": w(jax.random.fold_in(key, 0), (VOCAB, HIDDEN)),      # f32
        "ln": jnp.stack(ln_list),                                     # (2L+1, 1, H) f32
        "wqkv": jnp.stack(wqkv_list).astype(jnp.bfloat16),            # (L, H, 5H)
        "wgu": jnp.stack(wgu_list).astype(jnp.bfloat16),              # (L, H, 2I)
        "wout": jnp.stack(wout_list).astype(jnp.bfloat16),            # (L, H+I, H)
    }


def transformers_model_forward(params, input_ids, positions):
    """Mirrors TransformersModel.forward:
    input_ids[None, ...] -> HF model -> output[0][0, ...] == hidden_states.
    Also accepts already-batched (B, S) ids for multi-request calls."""
    squeeze = input_ids.ndim == 1
    if squeeze:
        input_ids = input_ids[None, :]          # mirrors `input_ids[None, ...]`
        positions = positions[None, :]
    batch, seq = input_ids.shape
    assert seq == SEQ

    rope = _rope_cos_sin(positions)             # (B, 2, S, H)
    n_layers = N_LAYERS

    grid_spec = pltpu.PrefetchScalarGridSpec(
        num_scalar_prefetch=1,                  # input_ids -> SMEM
        grid=(batch,),
        in_specs=[
            # weights / tables: constant block index -> DMA'd once, VMEM-resident
            pl.BlockSpec((VOCAB, HIDDEN), lambda b, ids: (0, 0)),
            pl.BlockSpec((1, 2, SEQ, HIDDEN), lambda b, ids: (b, 0, 0, 0)),
            pl.BlockSpec((2 * n_layers + 1, 1, HIDDEN), lambda b, ids: (0, 0, 0)),
            pl.BlockSpec((n_layers, HIDDEN, 5 * HIDDEN), lambda b, ids: (0, 0, 0)),
            pl.BlockSpec((n_layers, HIDDEN, 2 * INTER), lambda b, ids: (0, 0, 0)),
            pl.BlockSpec((n_layers, HIDDEN + INTER, HIDDEN), lambda b, ids: (0, 0, 0)),
        ],
        out_specs=pl.BlockSpec((1, SEQ, HIDDEN), lambda b, ids: (b, 0, 0)),
        scratch_shapes=[pltpu.VMEM((SEQ, HIDDEN), jnp.float32)],
    )

    out = pl.pallas_call(
        _fused_forward_kernel,
        out_shape=jax.ShapeDtypeStruct((batch, SEQ, HIDDEN), jnp.float32),
        grid_spec=grid_spec,
        compiler_params=pltpu.CompilerParams(
            dimension_semantics=("parallel",)),
    )(input_ids.astype(jnp.int32), params["embed"], rope, params["ln"],
      params["wqkv"], params["wgu"], params["wout"])

    return out[0] if squeeze else out           # mirrors `[0, ...]`


if __name__ == "__main__":
    key = jax.random.PRNGKey(0)
    params = init_params(key)

    # single-sequence call, exactly mirroring TransformersModel.forward
    input_ids = jax.random.randint(jax.random.fold_in(key, 999), (SEQ,), 0, VOCAB,
                                   dtype=jnp.int32)
    positions = jnp.arange(SEQ, dtype=jnp.int32)

    fwd = jax.jit(transformers_model_forward)
    hidden_states = fwd(params, input_ids, positions)
    jax.block_until_ready(hidden_states)

    assert hidden_states.shape == (SEQ, HIDDEN)
    assert hidden_states.dtype == jnp.float32
    assert bool(jnp.all(jnp.isfinite(hidden_states)))

    # batched call exercising the parallel batch grid axis (2 requests / call)
    batch_ids = jax.random.randint(jax.random.fold_in(key, 1000), (2, SEQ), 0, VOCAB,
                                   dtype=jnp.int32)
    batch_pos = jnp.tile(jnp.arange(SEQ, dtype=jnp.int32)[None, :], (2, 1))
    batched = jax.jit(transformers_model_forward)(params, batch_ids, batch_pos)
    jax.block_until_ready(batched)

    assert batched.shape == (2, SEQ, HIDDEN)
    assert bool(jnp.all(jnp.isfinite(batched)))

    print("KERNEL_OK")
</pallas_src>

<mosaic_0001>
module attributes {stable_mosaic.version = 11 : i64} {
  func.func @_fused_forward_kernel(%arg0: i32, %arg1: memref<1x8xi32, #tpu.memory_space<smem>>, %arg2: memref<128x32xf32, #tpu.memory_space<vmem>>, %arg3: memref<1x2x8x32xf32, #tpu.memory_space<vmem>>, %arg4: memref<5x1x32xf32, #tpu.memory_space<vmem>>, %arg5: memref<2x32x160xbf16, #tpu.memory_space<vmem>>, %arg6: memref<2x32x128xbf16, #tpu.memory_space<vmem>>, %arg7: memref<2x96x32xbf16, #tpu.memory_space<vmem>>, %arg8: memref<1x8x32xf32, #tpu.memory_space<vmem>>, %arg9: memref<8x32xf32, #tpu.memory_space<vmem>>) attributes {dimension_semantics = [#tpu.dimension_semantics<parallel>], iteration_bounds = array<i64: 1>, scalar_prefetch = 1 : i64, scratch_operands = 1 : i64, tpu.core_type = #tpu.core_type<tc>, window_params = [{pipeline_mode = #tpu.pipeline_mode<synchronous>, transform_indices = @transform_0, window_bounds = array<i64: 128, 32>}, {transform_indices = @transform_1, window_bounds = array<i64: 1, 2, 8, 32>}, {pipeline_mode = #tpu.pipeline_mode<synchronous>, transform_indices = @transform_2, window_bounds = array<i64: 5, 1, 32>}, {pipeline_mode = #tpu.pipeline_mode<synchronous>, transform_indices = @transform_3, window_bounds = array<i64: 2, 32, 160>}, {pipeline_mode = #tpu.pipeline_mode<synchronous>, transform_indices = @transform_4, window_bounds = array<i64: 2, 32, 128>}, {pipeline_mode = #tpu.pipeline_mode<synchronous>, transform_indices = @transform_5, window_bounds = array<i64: 2, 96, 32>}, {transform_indices = @transform_6, window_bounds = array<i64: 1, 8, 32>}]} {
    %0 = arith.index_cast %arg0 : i32 to index
    %c0 = arith.constant 0 : index
    %1 = memref.load %arg1[%0, %c0] : memref<1x8xi32, #tpu.memory_space<smem>>
    %2 = arith.index_cast %1 : i32 to index
    %c0_0 = arith.constant 0 : index
    %3 = vector.load %arg2[%2, %c0_0] : memref<128x32xf32, #tpu.memory_space<vmem>>, vector<1x32xf32>
    %c0_1 = arith.constant 0 : index
    %c0_2 = arith.constant 0 : index
    %4 = vector.load %arg9[%c0_1, %c0_2] : memref<8x32xf32, #tpu.memory_space<vmem>>, vector<1x32xf32>
    tpu.vector_store %arg9[%c0_1, %c0_2], %3 {strides = array<i32>} : memref<8x32xf32, #tpu.memory_space<vmem>>, vector<1x32xf32>,
    %5 = arith.index_cast %arg0 : i32 to index
    %c1 = arith.constant 1 : index
    %6 = memref.load %arg1[%5, %c1] : memref<1x8xi32, #tpu.memory_space<smem>>
    %7 = arith.index_cast %6 : i32 to index
    %c0_3 = arith.constant 0 : index
    %8 = vector.load %arg2[%7, %c0_3] : memref<128x32xf32, #tpu.memory_space<vmem>>, vector<1x32xf32>
    %c1_4 = arith.constant 1 : index
    %c0_5 = arith.constant 0 : index
    %9 = vector.load %arg9[%c1_4, %c0_5] : memref<8x32xf32, #tpu.memory_space<vmem>>, vector<1x32xf32>
    tpu.vector_store %arg9[%c1_4, %c0_5], %8 {strides = array<i32>} : memref<8x32xf32, #tpu.memory_space<vmem>>, vector<1x32xf32>,
    %10 = arith.index_cast %arg0 : i32 to index
    %c2 = arith.constant 2 : index
    %11 = memref.load %arg1[%10, %c2] : memref<1x8xi32, #tpu.memory_space<smem>>
    %12 = arith.index_cast %11 : i32 to index
    %c0_6 = arith.constant 0 : index
    %13 = vector.load %arg2[%12, %c0_6] : memref<128x32xf32, #tpu.memory_space<vmem>>, vector<1x32xf32>
    %c2_7 = arith.constant 2 : index
    %c0_8 = arith.constant 0 : index
    %14 = vector.load %arg9[%c2_7, %c0_8] : memref<8x32xf32, #tpu.memory_space<vmem>>, vector<1x32xf32>
    tpu.vector_store %arg9[%c2_7, %c0_8], %13 {strides = array<i32>} : memref<8x32xf32, #tpu.memory_space<vmem>>, vector<1x32xf32>,
    %15 = arith.index_cast %arg0 : i32 to index
    %c3 = arith.constant 3 : index
    %16 = memref.load %arg1[%15, %c3] : memref<1x8xi32, #tpu.memory_space<smem>>
    %17 = arith.index_cast %16 : i32 to index
    %c0_9 = arith.constant 0 : index
    %18 = vector.load %arg2[%17, %c0_9] : memref<128x32xf32, #tpu.memory_space<vmem>>, vector<1x32xf32>
    %c3_10 = arith.constant 3 : index
    %c0_11 = arith.constant 0 : index
    %19 = vector.load %arg9[%c3_10, %c0_11] : memref<8x32xf32, #tpu.memory_space<vmem>>, vector<1x32xf32>
    tpu.vector_store %arg9[%c3_10, %c0_11], %18 {strides = array<i32>} : memref<8x32xf32, #tpu.memory_space<vmem>>, vector<1x32xf32>,
    %20 = arith.index_cast %arg0 : i32 to index
    %c4 = arith.constant 4 : index
    %21 = memref.load %arg1[%20, %c4] : memref<1x8xi32, #tpu.memory_space<smem>>
    %22 = arith.index_cast %21 : i32 to index
    %c0_12 = arith.constant 0 : index
    %23 = vector.load %arg2[%22, %c0_12] : memref<128x32xf32, #tpu.memory_space<vmem>>, vector<1x32xf32>
    %c4_13 = arith.constant 4 : index
    %c0_14 = arith.constant 0 : index
    %24 = vector.load %arg9[%c4_13, %c0_14] : memref<8x32xf32, #tpu.memory_space<vmem>>, vector<1x32xf32>
    tpu.vector_store %arg9[%c4_13, %c0_14], %23 {strides = array<i32>} : memref<8x32xf32, #tpu.memory_space<vmem>>, vector<1x32xf32>,
    %25 = arith.index_cast %arg0 : i32 to index
    %c5 = arith.constant 5 : index
    %26 = memref.load %arg1[%25, %c5] : memref<1x8xi32, #tpu.memory_space<smem>>
    %27 = arith.index_cast %26 : i32 to index
    %c0_15 = arith.constant 0 : index
    %28 = vector.load %arg2[%27, %c0_15] : memref<128x32xf32, #tpu.memory_space<vmem>>, vector<1x32xf32>
    %c5_16 = arith.constant 5 : index
    %c0_17 = arith.constant 0 : index
    %29 = vector.load %arg9[%c5_16, %c0_17] : memref<8x32xf32, #tpu.memory_space<vmem>>, vector<1x32xf32>
    tpu.vector_store %arg9[%c5_16, %c0_17], %28 {strides = array<i32>} : memref<8x32xf32, #tpu.memory_space<vmem>>, vector<1x32xf32>,
    %30 = arith.index_cast %arg0 : i32 to index
    %c6 = arith.constant 6 : index
    %31 = memref.load %arg1[%30, %c6] : memref<1x8xi32, #tpu.memory_space<smem>>
    %32 = arith.index_cast %31 : i32 to index
    %c0_18 = arith.constant 0 : index
    %33 = vector.load %arg2[%32, %c0_18] : memref<128x32xf32, #tpu.memory_space<vmem>>, vector<1x32xf32>
    %c6_19 = arith.constant 6 : index
    %c0_20 = arith.constant 0 : index
    %34 = vector.load %arg9[%c6_19, %c0_20] : memref<8x32xf32, #tpu.memory_space<vmem>>, vector<1x32xf32>
    tpu.vector_store %arg9[%c6_19, %c0_20], %33 {strides = array<i32>} : memref<8x32xf32, #tpu.memory_space<vmem>>, vector<1x32xf32>,
    %35 = arith.index_cast %arg0 : i32 to index
    %c7 = arith.constant 7 : index
    %36 = memref.load %arg1[%35, %c7] : memref<1x8xi32, #tpu.memory_space<smem>>
    %37 = arith.index_cast %36 : i32 to index
    %c0_21 = arith.constant 0 : index
    %38 = vector.load %arg2[%37, %c0_21] : memref<128x32xf32, #tpu.memory_space<vmem>>, vector<1x32xf32>
    %c7_22 = arith.constant 7 : index
    %c0_23 = arith.constant 0 : index
    %39 = vector.load %arg9[%c7_22, %c0_23] : memref<8x32xf32, #tpu.memory_space<vmem>>, vector<1x32xf32>
    tpu.vector_store %arg9[%c7_22, %c0_23], %38 {strides = array<i32>} : memref<8x32xf32, #tpu.memory_space<vmem>>, vector<1x32xf32>,
    %c0_24 = arith.constant 0 : index
    %c0_25 = arith.constant 0 : index
    %40 = vector.load %arg9[%c0_24, %c0_25] : memref<8x32xf32, #tpu.memory_space<vmem>>, vector<8x32xf32>
    %c0_26 = arith.constant 0 : index
    %c0_27 = arith.constant 0 : index
    %c0_28 = arith.constant 0 : index
    %c0_29 = arith.constant 0 : index
    %41 = vector.load %arg3[%c0_26, %c0_27, %c0_28, %c0_29] : memref<1x2x8x32xf32, #tpu.memory_space<vmem>>, vector<1x1x8x32xf32>
    %42 = vector.shape_cast %41 : vector<1x1x8x32xf32> to vector<8x32xf32>
    %c0_30 = arith.constant 0 : index
    %c1_31 = arith.constant 1 : index
    %c0_32 = arith.constant 0 : index
    %c0_33 = arith.constant 0 : index
    %43 = vector.load %arg3[%c0_30, %c1_31, %c0_32, %c0_33] : memref<1x2x8x32xf32, #tpu.memory_space<vmem>>, vector<1x1x8x32xf32>
    %44 = vector.shape_cast %43 : vector<1x1x8x32xf32> to vector<8x32xf32>
    %45 = tpu.iota {dimensions = array<i32: 0>} : vector<8x8xi32>
    %46 = tpu.iota {dimensions = array<i32: 1>} : vector<8x8xi32>
    %47 = arith.cmpi sle, %46, %45 : vector<8x8xi32>
    %cst = arith.constant 0.000000e+00 : f32
    %cst_34 = arith.constant -1.000000e+30 : f32
    %48 = vector.broadcast %cst : f32 to vector<8x8xf32>
    %49 = vector.broadcast %cst_34 : f32 to vector<8x8xf32>
    %50 = arith.select %47, %48, %49 : vector<8x8xi1>, vector<8x8xf32>
    %51 = vector.shape_cast %50 : vector<8x8xf32> to vector<1x8x8xf32>
    %c0_35 = arith.constant 0 : index
    %c0_36 = arith.constant 0 : index
    %c0_37 = arith.constant 0 : index
    %52 = vector.load %arg4[%c0_35, %c0_36, %c0_37] : memref<5x1x32xf32, #tpu.memory_space<vmem>>, vector<1x1x32xf32>
    %53 = vector.shape_cast %52 : vector<1x1x32xf32> to vector<1x32xf32>
    %54 = arith.mulf %40, %40 : vector<8x32xf32>
    %cst_38 = arith.constant dense<0.000000e+00> : vector<8xf32>
    %55 = vector.multi_reduction <add>, %54, %cst_38 [1] : vector<8x32xf32> to vector<8xf32>
    %56 = vector.shape_cast %55 : vector<8xf32> to vector<8x1xf32>
    %cst_39 = arith.constant 3.200000e+01 : f32
    %57 = vector.broadcast %cst_39 : f32 to vector<8x1xf32>
    %58 = arith.divf %56, %57 : vector<8x1xf32>
    %cst_40 = arith.constant 9.99999997E-7 : f32
    %59 = vector.broadcast %cst_40 : f32 to vector<8x1xf32>
    %60 = arith.addf %58, %59 : vector<8x1xf32>
    %61 = math.rsqrt %60 : vector<8x1xf32>
    %62 = vector.broadcast %61 : vector<8x1xf32> to vector<8x32xf32>
    %63 = arith.mulf %40, %62 : vector<8x32xf32>
    %64 = vector.broadcast %53 : vector<1x32xf32> to vector<8x32xf32>
    %65 = arith.mulf %63, %64 : vector<8x32xf32>
    %66 = arith.truncf %65 : vector<8x32xf32> to vector<8x32xbf16>
    %c0_41 = arith.constant 0 : index
    %c0_42 = arith.constant 0 : index
    %c0_43 = arith.constant 0 : index
    %67 = vector.load %arg5[%c0_41, %c0_42, %c0_43] : memref<2x32x160xbf16, #tpu.memory_space<vmem>>, vector<1x32x160xbf16>
    %68 = vector.shape_cast %67 : vector<1x32x160xbf16> to vector<32x160xbf16>
    %cst_44 = arith.constant dense<0.000000e+00> : vector<8x160xf32>
    %69 = tpu.matmul %66, %68, %cst_44 {dimension_numbers = #tpu.dot_dimension_numbers<[1], [0], [0], [1], [0, 0, 1, 1], [], []>} : vector<8x32xbf16>, vector<32x160xbf16>, vector<8x160xf32> -> vector<8x160xf32>
    %70 = vector.extract_strided_slice %69 {offsets = [0, 0], sizes = [8, 32], strides = [1, 1]} : vector<8x160xf32> to vector<8x32xf32>
    %71 = vector.extract_strided_slice %69 {offsets = [0, 32], sizes = [8, 32], strides = [1, 1]} : vector<8x160xf32> to vector<8x32xf32>
    %72 = vector.extract_strided_slice %69 {offsets = [0, 64], sizes = [8, 32], strides = [1, 1]} : vector<8x160xf32> to vector<8x32xf32>
    %73 = vector.extract_strided_slice %69 {offsets = [0, 96], sizes = [8, 32], strides = [1, 1]} : vector<8x160xf32> to vector<8x32xf32>
    %74 = vector.extract_strided_slice %69 {offsets = [0, 128], sizes = [8, 32], strides = [1, 1]} : vector<8x160xf32> to vector<8x32xf32>
    %75 = arith.mulf %70, %42 : vector<8x32xf32>
    %76 = arith.mulf %73, %44 : vector<8x32xf32>
    %77 = arith.addf %75, %76 : vector<8x32xf32>
    %78 = arith.mulf %71, %42 : vector<8x32xf32>
    %79 = arith.mulf %74, %44 : vector<8x32xf32>
    %80 = arith.addf %78, %79 : vector<8x32xf32>
    %81 = arith.truncf %77 : vector<8x32xf32> to vector<8x32xbf16>
    %82 = vector.shape_cast %81 : vector<8x32xbf16> to vector<8x4x8xbf16>
    %83 = tpu.transpose %82, [1, 0, 2] : vector<8x4x8xbf16> -> vector<4x8x8xbf16>
    %84 = arith.truncf %80 : vector<8x32xf32> to vector<8x32xbf16>
    %85 = vector.shape_cast %84 : vector<8x32xbf16> to vector<8x4x8xbf16>
    %86 = tpu.transpose %85, [1, 0, 2] : vector<8x4x8xbf16> -> vector<4x8x8xbf16>
    %87 = arith.truncf %72 : vector<8x32xf32> to vector<8x32xbf16>
    %88 = vector.shape_cast %87 : vector<8x32xbf16> to vector<8x4x8xbf16>
    %89 = tpu.transpose %88, [1, 0, 2] : vector<8x4x8xbf16> -> vector<4x8x8xbf16>
    "tpu.trace_start"() <{level = 10 : i32, message = "hqd,hkd->hqk"}> : () -> ()
    %cst_45 = arith.constant dense<0.000000e+00> : vector<4x8x8xf32>
    %90 = tpu.matmul %83, %86, %cst_45 {dimension_numbers = #tpu.dot_dimension_numbers<[2], [2], [1], [1], [0, 0, 0, 1, 1, 1], [0], [0]>} : vector<4x8x8xbf16>, vector<4x8x8xbf16>, vector<4x8x8xf32> -> vector<4x8x8xf32>
    "tpu.trace_stop"() : () -> ()
    %91 = vector.broadcast %51 : vector<1x8x8xf32> to vector<4x8x8xf32>
    %92 = arith.addf %90, %91 : vector<4x8x8xf32>
    %cst_46 = arith.constant dense<0xFF800000> : vector<4x8xf32>
    %93 = vector.multi_reduction <maximumf>, %92, %cst_46 [2] : vector<4x8x8xf32> to vector<4x8xf32>
    %94 = vector.shape_cast %93 : vector<4x8xf32> to vector<4x8x1xf32>
    %95 = vector.broadcast %94 : vector<4x8x1xf32> to vector<4x8x8xf32>
    %96 = arith.subf %92, %95 : vector<4x8x8xf32>
    %97 = math.exp %96 : vector<4x8x8xf32>
    %cst_47 = arith.constant dense<0.000000e+00> : vector<4x8xf32>
    %98 = vector.multi_reduction <add>, %97, %cst_47 [2] : vector<4x8x8xf32> to vector<4x8xf32>
    %99 = vector.shape_cast %98 : vector<4x8xf32> to vector<4x8x1xf32>
    %100 = vector.broadcast %99 : vector<4x8x1xf32> to vector<4x8x8xf32>
    %101 = arith.divf %97, %100 : vector<4x8x8xf32>
    %102 = arith.truncf %101 : vector<4x8x8xf32> to vector<4x8x8xbf16>
    "tpu.trace_start"() <{level = 10 : i32, message = "hqk,hkd->hqd"}> : () -> ()
    %cst_48 = arith.constant dense<0.000000e+00> : vector<4x8x8xf32>
    %103 = tpu.matmul %102, %89, %cst_48 {dimension_numbers = #tpu.dot_dimension_numbers<[2], [1], [1], [2], [0, 0, 0, 1, 1, 2], [0], [0]>} : vector<4x8x8xbf16>, vector<4x8x8xbf16>, vector<4x8x8xf32> -> vector<4x8x8xf32>
    "tpu.trace_stop"() : () -> ()
    %104 = tpu.transpose %103, [1, 0, 2] : vector<4x8x8xf32> -> vector<8x4x8xf32>
    %105 = vector.shape_cast %104 : vector<8x4x8xf32> to vector<8x32xf32>
    %c0_49 = arith.constant 0 : index
    %c0_50 = arith.constant 0 : index
    %c0_51 = arith.constant 0 : index
    %106 = vector.load %arg7[%c0_49, %c0_50, %c0_51] : memref<2x96x32xbf16, #tpu.memory_space<vmem>>, vector<1x96x32xbf16>
    %107 = vector.shape_cast %106 : vector<1x96x32xbf16> to vector<96x32xbf16>
    %108 = arith.truncf %105 : vector<8x32xf32> to vector<8x32xbf16>
    %109 = vector.extract_strided_slice %107 {offsets = [0, 0], sizes = [32, 32], strides = [1, 1]} : vector<96x32xbf16> to vector<32x32xbf16>
    %cst_52 = arith.constant dense<0.000000e+00> : vector<8x32xf32>
    %110 = tpu.matmul %108, %109, %cst_52 {dimension_numbers = #tpu.dot_dimension_numbers<[1], [0], [0], [1], [0, 0, 1, 1], [], []>} : vector<8x32xbf16>, vector<32x32xbf16>, vector<8x32xf32> -> vector<8x32xf32>
    %111 = arith.addf %40, %110 : vector<8x32xf32>
    %c1_53 = arith.constant 1 : index
    %c0_54 = arith.constant 0 : index
    %c0_55 = arith.constant 0 : index
    %112 = vector.load %arg4[%c1_53, %c0_54, %c0_55] : memref<5x1x32xf32, #tpu.memory_space<vmem>>, vector<1x1x32xf32>
    %113 = vector.shape_cast %112 : vector<1x1x32xf32> to vector<1x32xf32>
    %114 = arith.mulf %111, %111 : vector<8x32xf32>
    %cst_56 = arith.constant dense<0.000000e+00> : vector<8xf32>
    %115 = vector.multi_reduction <add>, %114, %cst_56 [1] : vector<8x32xf32> to vector<8xf32>
    %116 = vector.shape_cast %115 : vector<8xf32> to vector<8x1xf32>
    %cst_57 = arith.constant 3.200000e+01 : f32
    %117 = vector.broadcast %cst_57 : f32 to vector<8x1xf32>
    %118 = arith.divf %116, %117 : vector<8x1xf32>
    %cst_58 = arith.constant 9.99999997E-7 : f32
    %119 = vector.broadcast %cst_58 : f32 to vector<8x1xf32>
    %120 = arith.addf %118, %119 : vector<8x1xf32>
    %121 = math.rsqrt %120 : vector<8x1xf32>
    %122 = vector.broadcast %121 : vector<8x1xf32> to vector<8x32xf32>
    %123 = arith.mulf %111, %122 : vector<8x32xf32>
    %124 = vector.broadcast %113 : vector<1x32xf32> to vector<8x32xf32>
    %125 = arith.mulf %123, %124 : vector<8x32xf32>
    %126 = arith.truncf %125 : vector<8x32xf32> to vector<8x32xbf16>
    %c0_59 = arith.constant 0 : index
    %c0_60 = arith.constant 0 : index
    %c0_61 = arith.constant 0 : index
    %127 = vector.load %arg6[%c0_59, %c0_60, %c0_61] : memref<2x32x128xbf16, #tpu.memory_space<vmem>>, vector<1x32x128xbf16>
    %128 = vector.shape_cast %127 : vector<1x32x128xbf16> to vector<32x128xbf16>
    %cst_62 = arith.constant dense<0.000000e+00> : vector<8x128xf32>
    %129 = tpu.matmul %126, %128, %cst_62 {dimension_numbers = #tpu.dot_dimension_numbers<[1], [0], [0], [1], [0, 0, 1, 1], [], []>} : vector<8x32xbf16>, vector<32x128xbf16>, vector<8x128xf32> -> vector<8x128xf32>
    %130 = vector.extract_strided_slice %129 {offsets = [0, 0], sizes = [8, 64], strides = [1, 1]} : vector<8x128xf32> to vector<8x64xf32>
    %131 = vector.extract_strided_slice %129 {offsets = [0, 64], sizes = [8, 64], strides = [1, 1]} : vector<8x128xf32> to vector<8x64xf32>
    %132 = arith.negf %130 : vector<8x64xf32>
    %133 = math.exp %132 : vector<8x64xf32>
    %cst_63 = arith.constant 1.000000e+00 : f32
    %134 = vector.broadcast %cst_63 : f32 to vector<8x64xf32>
    %135 = arith.addf %134, %133 : vector<8x64xf32>
    %136 = arith.divf %134, %135 : vector<8x64xf32>
    %137 = arith.mulf %130, %136 : vector<8x64xf32>
    %138 = arith.mulf %137, %131 : vector<8x64xf32>
    %139 = arith.truncf %138 : vector<8x64xf32> to vector<8x64xbf16>
    %140 = vector.extract_strided_slice %107 {offsets = [32, 0], sizes = [64, 32], strides = [1, 1]} : vector<96x32xbf16> to vector<64x32xbf16>
    %cst_64 = arith.constant dense<0.000000e+00> : vector<8x32xf32>
    %141 = tpu.matmul %139, %140, %cst_64 {dimension_numbers = #tpu.dot_dimension_numbers<[1], [0], [0], [1], [0, 0, 1, 1], [], []>} : vector<8x64xbf16>, vector<64x32xbf16>, vector<8x32xf32> -> vector<8x32xf32>
    %142 = arith.addf %111, %141 : vector<8x32xf32>
    %c2_65 = arith.constant 2 : index
    %c0_66 = arith.constant 0 : index
    %c0_67 = arith.constant 0 : index
    %143 = vector.load %arg4[%c2_65, %c0_66, %c0_67] : memref<5x1x32xf32, #tpu.memory_space<vmem>>, vector<1x1x32xf32>
    %144 = vector.shape_cast %143 : vector<1x1x32xf32> to vector<1x32xf32>
    %145 = arith.mulf %142, %142 : vector<8x32xf32>
    %cst_68 = arith.constant dense<0.000000e+00> : vector<8xf32>
    %146 = vector.multi_reduction <add>, %145, %cst_68 [1] : vector<8x32xf32> to vector<8xf32>
    %147 = vector.shape_cast %146 : vector<8xf32> to vector<8x1xf32>
    %cst_69 = arith.constant 3.200000e+01 : f32
    %148 = vector.broadcast %cst_69 : f32 to vector<8x1xf32>
    %149 = arith.divf %147, %148 : vector<8x1xf32>
    %cst_70 = arith.constant 9.99999997E-7 : f32
    %150 = vector.broadcast %cst_70 : f32 to vector<8x1xf32>
    %151 = arith.addf %149, %150 : vector<8x1xf32>
    %152 = math.rsqrt %151 : vector<8x1xf32>
    %153 = vector.broadcast %152 : vector<8x1xf32> to vector<8x32xf32>
    %154 = arith.mulf %142, %153 : vector<8x32xf32>
    %155 = vector.broadcast %144 : vector<1x32xf32> to vector<8x32xf32>
    %156 = arith.mulf %154, %155 : vector<8x32xf32>
    %157 = arith.truncf %156 : vector<8x32xf32> to vector<8x32xbf16>
    %c1_71 = arith.constant 1 : index
    %c0_72 = arith.constant 0 : index
    %c0_73 = arith.constant 0 : index
    %158 = vector.load %arg5[%c1_71, %c0_72, %c0_73] : memref<2x32x160xbf16, #tpu.memory_space<vmem>>, vector<1x32x160xbf16>
    %159 = vector.shape_cast %158 : vector<1x32x160xbf16> to vector<32x160xbf16>
    %cst_74 = arith.constant dense<0.000000e+00> : vector<8x160xf32>
    %160 = tpu.matmul %157, %159, %cst_74 {dimension_numbers = #tpu.dot_dimension_numbers<[1], [0], [0], [1], [0, 0, 1, 1], [], []>} : vector<8x32xbf16>, vector<32x160xbf16>, vector<8x160xf32> -> vector<8x160xf32>
    %161 = vector.extract_strided_slice %160 {offsets = [0, 0], sizes = [8, 32], strides = [1, 1]} : vector<8x160xf32> to vector<8x32xf32>
    %162 = vector.extract_strided_slice %160 {offsets = [0, 32], sizes = [8, 32], strides = [1, 1]} : vector<8x160xf32> to vector<8x32xf32>
    %163 = vector.extract_strided_slice %160 {offsets = [0, 64], sizes = [8, 32], strides = [1, 1]} : vector<8x160xf32> to vector<8x32xf32>
    %164 = vector.extract_strided_slice %160 {offsets = [0, 96], sizes = [8, 32], strides = [1, 1]} : vector<8x160xf32> to vector<8x32xf32>
    %165 = vector.extract_strided_slice %160 {offsets = [0, 128], sizes = [8, 32], strides = [1, 1]} : vector<8x160xf32> to vector<8x32xf32>
    %166 = arith.mulf %161, %42 : vector<8x32xf32>
    %167 = arith.mulf %164, %44 : vector<8x32xf32>
    %168 = arith.addf %166, %167 : vector<8x32xf32>
    %169 = arith.mulf %162, %42 : vector<8x32xf32>
    %170 = arith.mulf %165, %44 : vector<8x32xf32>
    %171 = arith.addf %169, %170 : vector<8x32xf32>
    %172 = arith.truncf %168 : vector<8x32xf32> to vector<8x32xbf16>
    %173 = vector.shape_cast %172 : vector<8x32xbf16> to vector<8x4x8xbf16>
    %174 = tpu.transpose %173, [1, 0, 2] : vector<8x4x8xbf16> -> vector<4x8x8xbf16>
    %175 = arith.truncf %171 : vector<8x32xf32> to vector<8x32xbf16>
    %176 = vector.shape_cast %175 : vector<8x32xbf16> to vector<8x4x8xbf16>
    %177 = tpu.transpose %176, [1, 0, 2] : vector<8x4x8xbf16> -> vector<4x8x8xbf16>
    %178 = arith.truncf %163 : vector<8x32xf32> to vector<8x32xbf16>
    %179 = vector.shape_cast %178 : vector<8x32xbf16> to vector<8x4x8xbf16>
    %180 = tpu.transpose %179, [1, 0, 2] : vector<8x4x8xbf16> -> vector<4x8x8xbf16>
    "tpu.trace_start"() <{level = 10 : i32, message = "hqd,hkd->hqk"}> : () -> ()
    %cst_75 = arith.constant dense<0.000000e+00> : vector<4x8x8xf32>
    %181 = tpu.matmul %174, %177, %cst_75 {dimension_numbers = #tpu.dot_dimension_numbers<[2], [2], [1], [1], [0, 0, 0, 1, 1, 1], [0], [0]>} : vector<4x8x8xbf16>, vector<4x8x8xbf16>, vector<4x8x8xf32> -> vector<4x8x8xf32>
    "tpu.trace_stop"() : () -> ()
    %182 = vector.broadcast %51 : vector<1x8x8xf32> to vector<4x8x8xf32>
    %183 = arith.addf %181, %182 : vector<4x8x8xf32>
    %cst_76 = arith.constant dense<0xFF800000> : vector<4x8xf32>
    %184 = vector.multi_reduction <maximumf>, %183, %cst_76 [2] : vector<4x8x8xf32> to vector<4x8xf32>
    %185 = vector.shape_cast %184 : vector<4x8xf32> to vector<4x8x1xf32>
    %186 = vector.broadcast %185 : vector<4x8x1xf32> to vector<4x8x8xf32>
    %187 = arith.subf %183, %186 : vector<4x8x8xf32>
    %188 = math.exp %187 : vector<4x8x8xf32>
    %cst_77 = arith.constant dense<0.000000e+00> : vector<4x8xf32>
    %189 = vector.multi_reduction <add>, %188, %cst_77 [2] : vector<4x8x8xf32> to vector<4x8xf32>
    %190 = vector.shape_cast %189 : vector<4x8xf32> to vector<4x8x1xf32>
    %191 = vector.broadcast %190 : vector<4x8x1xf32> to vector<4x8x8xf32>
    %192 = arith.divf %188, %191 : vector<4x8x8xf32>
    %193 = arith.truncf %192 : vector<4x8x8xf32> to vector<4x8x8xbf16>
    "tpu.trace_start"() <{level = 10 : i32, message = "hqk,hkd->hqd"}> : () -> ()
    %cst_78 = arith.constant dense<0.000000e+00> : vector<4x8x8xf32>
    %194 = tpu.matmul %193, %180, %cst_78 {dimension_numbers = #tpu.dot_dimension_numbers<[2], [1], [1], [2], [0, 0, 0, 1, 1, 2], [0], [0]>} : vector<4x8x8xbf16>, vector<4x8x8xbf16>, vector<4x8x8xf32> -> vector<4x8x8xf32>
    "tpu.trace_stop"() : () -> ()
    %195 = tpu.transpose %194, [1, 0, 2] : vector<4x8x8xf32> -> vector<8x4x8xf32>
    %196 = vector.shape_cast %195 : vector<8x4x8xf32> to vector<8x32xf32>
    %c1_79 = arith.constant 1 : index
    %c0_80 = arith.constant 0 : index
    %c0_81 = arith.constant 0 : index
    %197 = vector.load %arg7[%c1_79, %c0_80, %c0_81] : memref<2x96x32xbf16, #tpu.memory_space<vmem>>, vector<1x96x32xbf16>
    %198 = vector.shape_cast %197 : vector<1x96x32xbf16> to vector<96x32xbf16>
    %199 = arith.truncf %196 : vector<8x32xf32> to vector<8x32xbf16>
    %200 = vector.extract_strided_slice %198 {offsets = [0, 0], sizes = [32, 32], strides = [1, 1]} : vector<96x32xbf16> to vector<32x32xbf16>
    %cst_82 = arith.constant dense<0.000000e+00> : vector<8x32xf32>
    %201 = tpu.matmul %199, %200, %cst_82 {dimension_numbers = #tpu.dot_dimension_numbers<[1], [0], [0], [1], [0, 0, 1, 1], [], []>} : vector<8x32xbf16>, vector<32x32xbf16>, vector<8x32xf32> -> vector<8x32xf32>
    %202 = arith.addf %142, %201 : vector<8x32xf32>
    %c3_83 = arith.constant 3 : index
    %c0_84 = arith.constant 0 : index
    %c0_85 = arith.constant 0 : index
    %203 = vector.load %arg4[%c3_83, %c0_84, %c0_85] : memref<5x1x32xf32, #tpu.memory_space<vmem>>, vector<1x1x32xf32>
    %204 = vector.shape_cast %203 : vector<1x1x32xf32> to vector<1x32xf32>
    %205 = arith.mulf %202, %202 : vector<8x32xf32>
    %cst_86 = arith.constant dense<0.000000e+00> : vector<8xf32>
    %206 = vector.multi_reduction <add>, %205, %cst_86 [1] : vector<8x32xf32> to vector<8xf32>
    %207 = vector.shape_cast %206 : vector<8xf32> to vector<8x1xf32>
    %cst_87 = arith.constant 3.200000e+01 : f32
    %208 = vector.broadcast %cst_87 : f32 to vector<8x1xf32>
    %209 = arith.divf %207, %208 : vector<8x1xf32>
    %cst_88 = arith.constant 9.99999997E-7 : f32
    %210 = vector.broadcast %cst_88 : f32 to vector<8x1xf32>
    %211 = arith.addf %209, %210 : vector<8x1xf32>
    %212 = math.rsqrt %211 : vector<8x1xf32>
    %213 = vector.broadcast %212 : vector<8x1xf32> to vector<8x32xf32>
    %214 = arith.mulf %202, %213 : vector<8x32xf32>
    %215 = vector.broadcast %204 : vector<1x32xf32> to vector<8x32xf32>
    %216 = arith.mulf %214, %215 : vector<8x32xf32>
    %217 = arith.truncf %216 : vector<8x32xf32> to vector<8x32xbf16>
    %c1_89 = arith.constant 1 : index
    %c0_90 = arith.constant 0 : index
    %c0_91 = arith.constant 0 : index
    %218 = vector.load %arg6[%c1_89, %c0_90, %c0_91] : memref<2x32x128xbf16, #tpu.memory_space<vmem>>, vector<1x32x128xbf16>
    %219 = vector.shape_cast %218 : vector<1x32x128xbf16> to vector<32x128xbf16>
    %cst_92 = arith.constant dense<0.000000e+00> : vector<8x128xf32>
    %220 = tpu.matmul %217, %219, %cst_92 {dimension_numbers = #tpu.dot_dimension_numbers<[1], [0], [0], [1], [0, 0, 1, 1], [], []>} : vector<8x32xbf16>, vector<32x128xbf16>, vector<8x128xf32> -> vector<8x128xf32>
    %221 = vector.extract_strided_slice %220 {offsets = [0, 0], sizes = [8, 64], strides = [1, 1]} : vector<8x128xf32> to vector<8x64xf32>
    %222 = vector.extract_strided_slice %220 {offsets = [0, 64], sizes = [8, 64], strides = [1, 1]} : vector<8x128xf32> to vector<8x64xf32>
    %223 = arith.negf %221 : vector<8x64xf32>
    %224 = math.exp %223 : vector<8x64xf32>
    %cst_93 = arith.constant 1.000000e+00 : f32
    %225 = vector.broadcast %cst_93 : f32 to vector<8x64xf32>
    %226 = arith.addf %225, %224 : vector<8x64xf32>
    %227 = arith.divf %225, %226 : vector<8x64xf32>
    %228 = arith.mulf %221, %227 : vector<8x64xf32>
    %229 = arith.mulf %228, %222 : vector<8x64xf32>
    %230 = arith.truncf %229 : vector<8x64xf32> to vector<8x64xbf16>
    %231 = vector.extract_strided_slice %198 {offsets = [32, 0], sizes = [64, 32], strides = [1, 1]} : vector<96x32xbf16> to vector<64x32xbf16>
    %cst_94 = arith.constant dense<0.000000e+00> : vector<8x32xf32>
    %232 = tpu.matmul %230, %231, %cst_94 {dimension_numbers = #tpu.dot_dimension_numbers<[1], [0], [0], [1], [0, 0, 1, 1], [], []>} : vector<8x64xbf16>, vector<64x32xbf16>, vector<8x32xf32> -> vector<8x32xf32>
    %233 = arith.addf %202, %232 : vector<8x32xf32>
    %c4_95 = arith.constant 4 : index
    %c0_96 = arith.constant 0 : index
    %c0_97 = arith.constant 0 : index
    %234 = vector.load %arg4[%c4_95, %c0_96, %c0_97] : memref<5x1x32xf32, #tpu.memory_space<vmem>>, vector<1x1x32xf32>
    %235 = vector.shape_cast %234 : vector<1x1x32xf32> to vector<1x32xf32>
    %236 = arith.mulf %233, %233 : vector<8x32xf32>
    %cst_98 = arith.constant dense<0.000000e+00> : vector<8xf32>
    %237 = vector.multi_reduction <add>, %236, %cst_98 [1] : vector<8x32xf32> to vector<8xf32>
    %238 = vector.shape_cast %237 : vector<8xf32> to vector<8x1xf32>
    %cst_99 = arith.constant 3.200000e+01 : f32
    %239 = vector.broadcast %cst_99 : f32 to vector<8x1xf32>
    %240 = arith.divf %238, %239 : vector<8x1xf32>
    %cst_100 = arith.constant 9.99999997E-7 : f32
    %241 = vector.broadcast %cst_100 : f32 to vector<8x1xf32>
    %242 = arith.addf %240, %241 : vector<8x1xf32>
    %243 = math.rsqrt %242 : vector<8x1xf32>
    %244 = vector.broadcast %243 : vector<8x1xf32> to vector<8x32xf32>
    %245 = arith.mulf %233, %244 : vector<8x32xf32>
    %246 = vector.broadcast %235 : vector<1x32xf32> to vector<8x32xf32>
    %247 = arith.mulf %245, %246 : vector<8x32xf32>
    %248 = vector.shape_cast %247 : vector<8x32xf32> to vector<1x8x32xf32>
    %c0_101 = arith.constant 0 : index
    %c0_102 = arith.constant 0 : index
    %c0_103 = arith.constant 0 : index
    %249 = vector.load %arg8[%c0_101, %c0_102, %c0_103] : memref<1x8x32xf32, #tpu.memory_space<vmem>>, vector<1x8x32xf32>
    tpu.vector_store %arg8[%c0_101, %c0_102, %c0_103], %248 {strides = array<i32>} : memref<1x8x32xf32, #tpu.memory_space<vmem>>, vector<1x8x32xf32>,
    return
  }
  func.func @transform_0(%arg0: i32, %arg1: memref<1x8xi32, #tpu.memory_space<smem>>) -> (i32, i32) {
    %c0_i32 = arith.constant 0 : i32
    %c0_i32_0 = arith.constant 0 : i32
    %c0_i32_1 = arith.constant 0 : i32
    return %c0_i32, %c0_i32_0 : i32, i32
  }
  func.func @transform_1(%arg0: i32, %arg1: memref<1x8xi32, #tpu.memory_space<smem>>) -> (i32, i32, i32, i32) {
    %c0_i32 = arith.constant 0 : i32
    %c0_i32_0 = arith.constant 0 : i32
    %c0_i32_1 = arith.constant 0 : i32
    %c0_i32_2 = arith.constant 0 : i32
    return %arg0, %c0_i32, %c0_i32_0, %c0_i32_1 : i32, i32, i32, i32
  }
  func.func @transform_2(%arg0: i32, %arg1: memref<1x8xi32, #tpu.memory_space<smem>>) -> (i32, i32, i32) {
    %c0_i32 = arith.constant 0 : i32
    %c0_i32_0 = arith.constant 0 : i32
    %c0_i32_1 = arith.constant 0 : i32
    %c0_i32_2 = arith.constant 0 : i32
    return %c0_i32, %c0_i32_0, %c0_i32_1 : i32, i32, i32
  }
  func.func @transform_3(%arg0: i32, %arg1: memref<1x8xi32, #tpu.memory_space<smem>>) -> (i32, i32, i32) {
    %c0_i32 = arith.constant 0 : i32
    %c0_i32_0 = arith.constant 0 : i32
    %c0_i32_1 = arith.constant 0 : i32
    %c0_i32_2 = arith.constant 0 : i32
    return %c0_i32, %c0_i32_0, %c0_i32_1 : i32, i32, i32
  }
  func.func @transform_4(%arg0: i32, %arg1: memref<1x8xi32, #tpu.memory_space<smem>>) -> (i32, i32, i32) {
    %c0_i32 = arith.constant 0 : i32
    %c0_i32_0 = arith.constant 0 : i32
    %c0_i32_1 = arith.constant 0 : i32
    %c0_i32_2 = arith.constant 0 : i32
    return %c0_i32, %c0_i32_0, %c0_i32_1 : i32, i32, i32
  }
  func.func @transform_5(%arg0: i32, %arg1: memref<1x8xi32, #tpu.memory_space<smem>>) -> (i32, i32, i32) {
    %c0_i32 = arith.constant 0 : i32
    %c0_i32_0 = arith.constant 0 : i32
    %c0_i32_1 = arith.constant 0 : i32
    %c0_i32_2 = arith.constant 0 : i32
    return %c0_i32, %c0_i32_0, %c0_i32_1 : i32, i32, i32
  }
  func.func @transform_6(%arg0: i32, %arg1: memref<1x8xi32, #tpu.memory_space<smem>>) -> (i32, i32, i32) {
    %c0_i32 = arith.constant 0 : i32
    %c0_i32_0 = arith.constant 0 : i32
    %c0_i32_1 = arith.constant 0 : i32
    return %arg0, %c0_i32, %c0_i32_0 : i32, i32, i32
  }
}

</mosaic_0001>

<bundles_post_ra>
// kernel: transformers_model_forward.1
= control target key start
LH: loop header
LB: loop body
LE: loop exit
PB: predicated region body
PF: predicated region fallthrough
CT: control target
= control target key end

     0   :  { %s2483_s27 = smov [#allocation4]   ;;  %s3156_s0 = inlined_call_operand.vmem [shape: s32[1,8], index: 0, kind: input, shape index: {}]   ;;  %s3157_s1 = inlined_call_operand.vmem [shape: f32[128,32], index: 1, kind: input, shape index: {}]   ;;  %s3158_s2 = inlined_call_operand.vmem [shape: f32[1,2,8,32], index: 2, kind: input, shape index: {}]   ;;  %s3159_s3 = inlined_call_operand.vmem [shape: f32[5,1,32], index: 3, kind: input, shape index: {}]   ;;  %s3160_s4 = inlined_call_operand.vmem [shape: bf16[2,32,160], index: 4, kind: input, shape index: {}]   ;;  %s3161_s5 = inlined_call_operand.vmem [shape: bf16[2,32,128], index: 5, kind: input, shape index: {}]   ;;  %s3162_s6 = inlined_call_operand.vmem [shape: bf16[2,96,32], index: 6, kind: input, shape index: {}]   ;;  %s3163_s7 = inlined_call_operand.hbm [shape: f32[1,8,32], index: 7, kind: output, shape index: {}]  }
   0x1   :  { %s13_s26 = sshll.u32 %s3156_s0, 4  ;;  %s14_s26 = int_to_ptr.vmem [resolvable:$true] %s13_s26 }
   0x2   :  { %16 = dma.vmem_to_smem %s14_s26, 16, %s2483_s27, [#allocation3] }
   0x3   :  { %2479 = dma.done.wait [#allocation3], 16 }
   0x4   :  { %2480 = vsyncadd [#allocation3], 4294967280 }
   0x5   :  { %19 = sfence }
   0x6   :  { %s35_s28 = sld [smem:[#allocation4]] }
   0x7   :  { %s2188_s29 = sld [smem:[#allocation4 + $0x1]] }
   0x8   :  { %s2189_s30 = sld [smem:[#allocation4 + $0x2]] }
   0x9   :  { %s2190_s8 = sld [smem:[#allocation4 + $0x3]] }
   0xa   :  { %20 = vsyncpa [#allocation6], 0  ;;  %s2191_s9 = sld [smem:[#allocation4 + $0x4]]  ;;  %vm38_vm0 = vcmask 253952   ;;  %vm87_vm1 = vcmask 261120   ;;  %v2484_v11 = vmov 32.0  }
   0xb   :  { %s2192_s10 = sld [smem:[#allocation4 + $0x5]]  ;;  %2388 = vrcp.f32 %v2484_v11  ;;  %v2206_v15 = vld [vmem:[%s3160_s4 + $0x10] sm:$0xf]  ;;  %v2347_v16 = vld [vmem:[%s3160_s4 + $0x14] sm:$0xf0]  ;;  %v76_v29 = vld [vmem:[%s3158_s2] sm:$0xff] }
   0xc   :  { %s36_s13 = scalar_lea.vmem %s3157_s1, %s35_s28  ;;  %s2193_s14 = sld [smem:[#allocation4 + $0x6]]  ;;  %v2346_v17 = vld [vmem:[%s3160_s4 + $0x14] sm:$0xf]  ;;  %v2207_v18 = vor.u32 %v2347_v16, %v2206_v15  ;;  %v2208_v19 = vld [vmem:[%s3160_s4 + $0x18] sm:$0xf0]  ;;  %v2195_v45 = vld [vmem:[%s3158_s2 + $0x8] sm:$0xff] }
   0xd   :  { %v37_v0 = vld [vmem:[%s36_s13] sm:$0x1]  ;;  %s42_s16 = scalar_lea.vmem %s3157_s1, %s2188_s29  ;;  %s2194_s17 = sld [smem:[#allocation4 + $0x7]]  ;;  %v2345_v21 = vld [vmem:[%s3160_s4 + $0x4] sm:$0xf0]  ;;  %v2211_v22 = vor.u32 %v2346_v17, %v2208_v19  ;;  %vm222_vm6 = vcmask 1047556  }
   0xe   :  { %39 = vst.msk [vmem:[#allocation2] sm:$0x1] %vm38_vm0, %v37_v0  ;;  %v43_v1 = vld [vmem:[%s42_s16] sm:$0x1]  ;;  %s47_s20 = scalar_lea.vmem %s3157_s1, %s2189_s30  ;;  %v2344_v23 = vld [vmem:[%s3160_s4 + $0x4] sm:$0xf]  ;;  %149 = vmatpush.bf16.msra.mxu0 %v2207_v18 }
   0xf   :  { %44 = vst.msk [vmem:[#allocation2 + $0x1] sm:$0x1] %vm38_vm0, %v43_v1  ;;  %v48_v2 = vld [vmem:[%s47_s20] sm:$0x1]  ;;  %s52_s23 = scalar_lea.vmem %s3157_s1, %s2190_s8  ;;  %v2200_v24 = vld [vmem:[%s3160_s4 + $0x8] sm:$0xf0]  ;;  %162 = vmatpush.bf16.msra.mxu1 %v2211_v22 }
  0x10   :  { %49 = vst.msk [vmem:[#allocation2 + $0x2] sm:$0x1] %vm38_vm0, %v48_v2  ;;  %v53_v3 = vld [vmem:[%s52_s23] sm:$0x1]  ;;  %s57_s26 = scalar_lea.vmem %s3157_s1, %s2191_s9  ;;  %v2203_v27 = vor.u32 %v2344_v23, %v2200_v24  ;;  %s2486_s13 = smov 96   ;;  %vm574_vm7 = vcmask 64512  }
  0x11   :  { %54 = vst.msk [vmem:[#allocation2 + $0x3] sm:$0x1] %vm38_vm0, %v53_v3  ;;  %v58_v4 = vld [vmem:[%s57_s26] sm:$0x1]  ;;  %s62_s29 = scalar_lea.vmem %s3157_s1, %s2192_s10  ;;  %v2389_v12 = vpop.eup %2388  ;;  %s2488_s10 = smov 120   ;;  %vm754_vm9 = vcmask 1043456  }
  0x12   :  { %59 = vst.msk [vmem:[#allocation2 + $0x4] sm:$0x1] %vm38_vm0, %v58_v4  ;;  %v63_v5 = vld [vmem:[%s62_s29] sm:$0x1]  ;;  %s67_s8 = scalar_lea.vmem %s3157_s1, %s2193_s14  ;;  %v92_v13 = vmul.f32 32.0, %v2389_v12  ;;  %vm96_vm2 = vweird.f32 %v2389_v12  ;;  %s2485_s29 = smov 32  }
  0x13   :  { %64 = vst.msk [vmem:[#allocation2 + $0x5] sm:$0x1] %vm38_vm0, %v63_v5  ;;  %v68_v6 = vld [vmem:[%s67_s8] sm:$0x1]  ;;  %s72_s9 = scalar_lea.vmem %s3157_s1, %s2194_s17  ;;  %163 = vmatpush.bf16.msra.mxu1 %v2203_v27  ;;  %s2489_s14 = smov 112  }
  0x14   :  { %69 = vst.msk [vmem:[#allocation2 + $0x6] sm:$0x1] %vm38_vm0, %v68_v6  ;;  %v73_v7 = vld [vmem:[%s72_s9] sm:$0x1]  ;;  %v93_v14 = vsub.f32 1.0, %v92_v13  ;;  %s2487_s9 = smov 104  }
  0x15   :  { %74 = vst.msk [vmem:[#allocation2 + $0x7] sm:$0x1] %vm38_vm0, %v73_v7  ;;  %v2198_v20 = vld [vmem:[%s3160_s4] sm:$0xf]  ;;  %s2490_s1 = smov 64   ;;  %s2494_s0 = smov 24  }
  0x16   :  { %v94_v25 = vmul.f32 %v2389_v12, %v93_v14  ;;  %v2199_v26 = vor.u32 %v2345_v21, %v2198_v20  ;;  %v2383_v40 = vld [vmem:[%s3159_s3] ss:$0 sm:$0xff]  ;;  %v2491_v3 = vmov 1983009808   ;;  %v2492_v13 = vmov 1934713408  }
  0x17   :  { %v213_v4 = vunpack.c.l.s4 %v2491_v3  ;;  %v227_v14 = vunpack.c.l.s4 %v2492_v13  ;;  %s2495_s15 = smov 16   ;;  %s2496_s16 = smov 8  }
  0x18   :  { %v95_v28 = vadd.f32 %v2389_v12, %v94_v25  ;;  %150 = vmatpush.bf16.msra.mxu0 %v2199_v26  ;;  %s2497_s12 = smov [#allocation5]   ;;  %s2171_s20 = sshll.u32 %s3163_s7, 4  ;;  %s2172_s20 = int_to_ptr.hbm [resolvable:$true] %s2171_s20 }
  0x19   :  { %v2640_v23 = vunpack.c.0.s8 %v227_v14  ;;  %s2169_s17 = sshll.u32 %s2497_s12, 4  ;;  %s2170_s17 = int_to_ptr.vmem [resolvable:$true] %s2169_s17 }
  0x1a   :  { %v2601_v30 = vsel %vm96_vm2, %v2389_v12, %v95_v28 }
  0x1c   :  { %v75_v8 = vld [vmem:[#allocation2] sm:$0xff] }
  0x1d   :  { %v86_v9 = vmul.f32 %v75_v8, %v75_v8 }
  0x1f   :  { %v88_v10 = vsel %vm87_vm1, %v86_v9, 0.0 }
  0x20   :  { %89 = vadd.xlane.f32.xlu0 %v88_v10 }
  0x34   :  { %181 = vrot.lane.b32.xlu0 %v76_v29, %s2485_s29 }
  0x93   :  { %v90_v31 = vpop.xlane.xlu0 %89 }
  0x94   :  { %v98_v32 = vmul.f32 %v2601_v30, %v90_v31 }
  0x96   :  { %v99_v33 = vadd.f32 1e-06, %v98_v32 }
  0x98   :  { %2390 = vrsqrt.f32 %v99_v33  ;;  %vm106_vm4 = vweird.f32 %v99_v33 }
  0x9e   :  { %v2391_v34 = vpop.eup %2390 }
  0x9f   :  { %v101_v35 = vmul.f32 %v2391_v34, %v99_v33  ;;  %vm107_vm3 = vweird.f32 %v2391_v34 }
  0xa0   :  { %vm108_vm5 = vmor %vm106_vm4, %vm107_vm3 }
  0xa1   :  { %v102_v36 = vmul.f32 %v2391_v34, %v101_v35 }
  0xa3   :  { %v103_v37 = vmul.f32 0.5, %v102_v36 }
  0xa5   :  { %v104_v38 = vsub.f32 1.5, %v103_v37 }
  0xa6   :  { %v2615_v51 = vpop.permute.xlu0 %181 }
  0xa7   :  { %v105_v39 = vmul.f32 %v2391_v34, %v104_v38 }
  0xa9   :  { %v109_v41 = vsel %vm108_vm5, %v2391_v34, %v105_v39 }
  0xaa   :  { %v110_v42 = vmul.f32 %v109_v41, %v75_v8  ;;  %v2636_v8 = vunpack.c.0.s8 %v213_v4 }
  0xac   :  { %v114_v43 = vmul.f32 %v2383_v40, %v110_v42 }
  0xae   :  { %v115_v44 = vpack.c.bf16 %v114_v43, %v114_v43 }
  0xb0   :  { %2212 = vmatmul.msk.bf16.vlgmr.msra.gmra.mxu0 %vm87_vm1, %v115_v44  ;;  %2213 = vmatmul.msk.bf16.vlgmr.msra.gmra.mxu1 %vm87_vm1, %v115_v44 }
 0x12d   :  { %v152_v46 = vpop.f32.mrf.mxu0  ;;  %v165_v47 = vpop.f32.mrf.mxu1 }
 0x12e   :  { %v185_v48 = vmul.f32 %v2195_v45, %v165_v47  ;;  %v184_v52 = vmul.f32 %v2615_v51, %v152_v46  ;;  %v169_v60 = vmul.f32 %v152_v46, %v76_v29  ;;  %v444_v1 = vpack.c.bf16 %v152_v46, %v152_v46 }
 0x130   :  { %187 = vrot.lane.b32.xlu1 %v185_v48, %s2485_s29 }
 0x135   :  { %v154_v49 = vpop.f32.mrf.mxu0  ;;  %v167_v50 = vpop.f32.mrf.mxu1 }
 0x138   :  { %171 = vrot.lane.b32.xlu1 %v2195_v45, %s2486_s13 }
 0x1a2   :  { %v188_v53 = vpop.permute.xlu1 %187 }
 0x1a3   :  { %v190_v54 = vadd.f32 %v188_v53, %v184_v52 }
 0x1a5   :  { %v314_v55 = vpack.c.bf16 %v190_v54, %v190_v54 }
 0x1a7   :  { %320 = vrot.lane.b32.xlu1 %v314_v55, %s2487_s9  ;;  %316 = vrot.lane.b32.xlu2 %v314_v55, %s2488_s10 }
 0x1aa   :  { %v2622_v56 = vpop.permute.xlu1 %171 }
 0x1ab   :  { %v174_v57 = vmul.f32 %v2622_v56, %v152_v46 }
 0x1af   :  { %322 = vrot.lane.b32.xlu1 %v314_v55, %s2486_s13  ;;  %318 = vrot.lane.b32.xlu2 %v314_v55, %s2489_s14 }
 0x1b7   :  { %176 = vrot.lane.b32.xlu2 %v174_v57, %s2485_s29 }
 0x201   :  { %v317_v58 = vpop.permute.xlu2 %316 }
 0x202   :  { %324 = vrot.lane.b32.xlu2 %v317_v58, %s2486_s13 }
 0x209   :  { %v319_v59 = vpop.permute.xlu2 %318 }
 0x20a   :  { %326 = vrot.lane.b32.xlu0 %v319_v59, %s2486_s13 }
 0x211   :  { %v177_v61 = vpop.permute.xlu2 %176 }
 0x212   :  { %v179_v62 = vadd.f32 %v177_v61, %v169_v60 }
 0x214   :  { %v191_v63 = vpack.c.bf16 %v179_v62, %v179_v62 }
 0x216   :  { %195 = vrot.lane.b32.xlu0 %v191_v63, %s2489_s14  ;;  %193 = vrot.lane.b32.xlu2 %v191_v63, %s2488_s10  ;;  %v202_v22 = vshrl.u32 %v191_v63, 16 }
 0x219   :  { %v321_v0 = vpop.permute.xlu1 %320 }
 0x21a   :  { %328 = vrot.lane.b32.xlu1 %v321_v0, %s2486_s13 }
 0x21e   :  { %450 = vrot.lane.b32.xlu0 %v444_v1, %s2487_s9  ;;  %446 = vrot.lane.b32.xlu2 %v444_v1, %s2488_s10 }
 0x221   :  { %v323_v5 = vpop.permute.xlu1 %322 }
 0x222   :  { %197 = vrot.lane.b32.xlu1 %v191_v63, %s2487_s9  ;;  %v333_v7 = vshrl.u32 %v323_v5, 16 }
 0x226   :  { %452 = vrot.lane.b32.xlu2 %v444_v1, %s2490_s1 }
 0x22a   :  { %448 = vrot.lane.b32.xlu1 %v444_v1, %s2489_s14 }
 0x25c   :  { %v325_v2 = vpop.permute.xlu2 %324 }
 0x25d   :  { %v334_v6 = vshrl.u32 %v325_v2, 16  ;;  %v332_v9 = vpack.i.b16 %v325_v2, %v323_v5 }
 0x25f   :  { %v335_v10 = vpack.i.b16 %v334_v6, %v333_v7  ;;  %v346_v15 = vperm.slane %v332_v9, %v2636_v8 }
 0x261   :  { %v372_v18 = vperm.slane %v335_v10, %v2636_v8  ;;  %v354_v24 = vrot.slane %v346_v15, 4 }
 0x263   :  { %v380_v29 = vrot.slane %v372_v18, 4 }
 0x270   :  { %v194_v11 = vpop.permute.xlu2 %193 }
 0x271   :  { %v203_v16 = vshrl.u32 %v194_v11, 16  ;;  %v201_v25 = vpack.i.b16 %v194_v11, %v191_v63 }
 0x273   :  { %v204_v28 = vpack.i.b16 %v203_v16, %v202_v22  ;;  %v215_v36 = vperm.slane %v201_v25, %v2636_v8 }
 0x275   :  { %v242_v40 = vperm.slane %v204_v28, %v2636_v8  ;;  %v224_v54 = vrot.slane %v215_v36, 4 }
 0x277   :  { %v250_v59 = vrot.slane %v242_v40, 4 }
 0x27c   :  { %v327_v12 = vpop.permute.xlu0 %326 }
 0x27d   :  { %v339_v19 = vshrl.u32 %v327_v12, 16 }
 0x288   :  { %v196_v34 = vpop.permute.xlu0 %195 }
 0x289   :  { %v208_v45 = vshrl.u32 %v196_v34, 16 }
 0x28c   :  { %v329_v17 = vpop.permute.xlu1 %328 }
 0x28d   :  { %v338_v20 = vpack.i.b16 %v329_v17, %v327_v12  ;;  %v340_v21 = vshrl.u32 %v329_v17, 16 }
 0x28f   :  { %v341_v26 = vpack.i.b16 %v340_v21, %v339_v19  ;;  %v351_v27 = vperm.slane %v338_v20, %v2636_v8 }
 0x291   :  { %v352_v31 = vrot.slane %v351_v27, 4  ;;  %v355_v32 = vsel %vm222_vm6, %v351_v27, %v354_v24  ;;  %v377_v33 = vperm.slane %v341_v26, %v2636_v8 }
 0x292   :  { %v363_v35 = vperm.slane %v355_v32, %v2640_v23 }
 0x293   :  { %v353_v37 = vsel %vm222_vm6, %v352_v31, %v346_v15  ;;  %v378_v38 = vrot.slane %v377_v33, 4  ;;  %v381_v39 = vsel %vm222_vm6, %v377_v33, %v380_v29 }
 0x294   :  { %v359_v41 = vperm.slane %v353_v37, %v2640_v23  ;;  %v366_v42 = vrot.slane %v363_v35, 4  ;;  %v389_v43 = vperm.slane %v381_v39, %v2640_v23  ;;  %v198_v44 = vpop.permute.xlu1 %197 }
 0x295   :  { %v379_v46 = vsel %vm222_vm6, %v378_v38, %v372_v18  ;;  %v207_v47 = vpack.i.b16 %v198_v44, %v196_v34  ;;  %v209_v48 = vshrl.u32 %v198_v44, 16 }
 0x296   :  { %v364_v49 = vrot.slane %v359_v41, 4  ;;  %v367_v50 = vsel %vm222_vm6, 0, %v366_v42  ;;  %v385_v52 = vperm.slane %v379_v46, %v2640_v23  ;;  %v392_v53 = vrot.slane %v389_v43, 4 }
 0x297   :  { %v399_v55 = vrot.slane %v367_v50, 4  ;;  %v210_v57 = vpack.i.b16 %v209_v48, %v208_v45  ;;  %v220_v58 = vperm.slane %v207_v47, %v2636_v8  ;;  %v394_v5 = vsel %vm222_vm6, %v366_v42, %v359_v41 }
 0x298   :  { %v365_v60 = vsel %vm222_vm6, 0, %v364_v49  ;;  %v390_v61 = vrot.slane %v385_v52, 4  ;;  %v393_v62 = vsel %vm222_vm6, 0, %v392_v53  ;;  %v413_v15 = vsel %vm222_vm6, %v392_v53, %v385_v52 }
 0x299   :  { %v418_v63 = vrot.slane %v393_v62, 4  ;;  %v221_v0 = vrot.slane %v220_v58, 4  ;;  %v225_v1 = vsel %vm222_vm6, %v220_v58, %v224_v54  ;;  %v247_v2 = vperm.slane %v210_v57, %v2636_v8 }
 0x29a   :  { %v233_v3 = vperm.slane %v225_v1, %v2640_v23  ;;  %v391_v4 = vsel %vm222_vm6, 0, %v390_v61  ;;  %v400_v6 = vsel %vm222_vm6, %v399_v55, %v365_v60  ;;  %v398_v17 = vperm.slane %v394_v5, %v2636_v8 }
 0x29b   :  { %v223_v7 = vsel %vm222_vm6, %v221_v0, %v215_v36  ;;  %v248_v9 = vrot.slane %v247_v2, 4  ;;  %v251_v10 = vsel %vm222_vm6, %v247_v2, %v250_v59  ;;  %v404_v11 = vperm.slane %v400_v6, %v2636_v8 }
 0x29c   :  { %v229_v12 = vperm.slane %v223_v7, %v2640_v23  ;;  %v236_v13 = vrot.slane %v233_v3, 4  ;;  %v259_v14 = vperm.slane %v251_v10, %v2640_v23  ;;  %v419_v19 = vsel %vm222_vm6, %v418_v63, %v391_v4 }
 0x29d   :  { %v249_v16 = vsel %vm222_vm6, %v248_v9, %v242_v40  ;;  %v405_v18 = vrot.slane %v404_v11, 4  ;;  %v417_v27 = vperm.slane %v413_v15, %v2636_v8  ;;  %v423_v28 = vperm.slane %v419_v19, %v2636_v8 }
 0x29e   :  { %v234_v20 = vrot.slane %v229_v12, 4  ;;  %v237_v21 = vsel %vm222_vm6, 0, %v236_v13  ;;  %v255_v22 = vperm.slane %v249_v16, %v2640_v23  ;;  %v262_v24 = vrot.slane %v259_v14, 4 }
 0x29f   :  { %v269_v25 = vrot.slane %v237_v21, 4  ;;  %v406_v26 = vsel %vm222_vm6, %v405_v18, %v398_v17  ;;  %v264_v34 = vsel %vm222_vm6, %v236_v13, %v229_v12  ;;  %v424_v36 = vrot.slane %v423_v28, 4 }
 0x2a0   :  { %v235_v29 = vsel %vm222_vm6, 0, %v234_v20  ;;  %v260_v31 = vrot.slane %v255_v22, 4  ;;  %v263_v32 = vsel %vm222_vm6, 0, %v262_v24  ;;  %v410_v33 = vperm.slane %v406_v26, %v2640_v23 }
 0x2a1   :  { %v288_v35 = vrot.slane %v263_v32, 4  ;;  %v270_v37 = vsel %vm222_vm6, %v269_v25, %v235_v29  ;;  %v425_v41 = vsel %vm222_vm6, %v424_v36, %v417_v27  ;;  %v268_v44 = vperm.slane %v264_v34, %v2636_v8 }
 0x2a2   :  { %v261_v38 = vsel %vm222_vm6, 0, %v260_v31  ;;  %v411_v39 = vrot.slane %v410_v33, 4  ;;  %v274_v40 = vperm.slane %v270_v37, %v2636_v8  ;;  %v429_v43 = vperm.slane %v425_v41, %v2640_v23 }
 0x2a3   :  { %v289_v42 = vsel %vm222_vm6, %v288_v35, %v261_v38  ;;  %v283_v46 = vsel %vm222_vm6, %v262_v24, %v255_v22  ;;  %v435_v47 = vshrl.u32 %v410_v33, 16  ;;  %v79_v20 = vlaneseq }
 0x2a4   :  { %v275_v45 = vrot.slane %v274_v40, 4  ;;  %v412_v48 = vsel %vm222_vm6, 0, %v411_v39  ;;  %v293_v49 = vperm.slane %v289_v42, %v2636_v8  ;;  %v434_v50 = vpack.i.b16 %v429_v43, %v410_v33 }
 0x2a5   :  { %v436_v52 = vshrl.u32 %v429_v43, 16  ;;  %v430_v53 = vrot.slane %v429_v43, 4  ;;  %v287_v57 = vperm.slane %v283_v46, %v2636_v8  ;;  %v441_v63 = vshrl.u32 %v412_v48, 16  ;;  %v451_v43 = vpop.permute.xlu0 %450 }
 0x2a6   :  { %v276_v54 = vsel %vm222_vm6, %v275_v45, %v268_v44  ;;  %v294_v58 = vrot.slane %v293_v49, 4  ;;  %v579_v59 = vsel %vm574_vm7, %v434_v50, 0  ;;  %v80_v21 = vshrl.u32 %v79_v20, 7  ;;  %v447_v44 = vpop.permute.xlu2 %446  ;;  %v449_v45 = vpop.permute.xlu1 %448 }
 0x2a7   :  { %v280_v55 = vperm.slane %v276_v54, %v2640_v23  ;;  %v437_v60 = vpack.i.b16 %v436_v52, %v435_v47  ;;  %v431_v61 = vsel %vm222_vm6, 0, %v430_v53  ;;  %588 = vmatpush.bf16.xpose.msra.mxu2 %v579_v59  ;;  %v82_v22 = vand.u32 127, %v79_v20 }
 0x2a8   :  { %v440_v62 = vpack.i.b16 %v431_v61, %v412_v48  ;;  %v442_v0 = vshrl.u32 %v431_v61, 16  ;;  %v295_v1 = vsel %vm222_vm6, %v294_v58, %v287_v57  ;;  %v2493_v24 = vmov -1e+30  }
 0x2a9   :  { %v598_v2 = vsel %vm574_vm7, %v437_v60, 0  ;;  %v299_v3 = vperm.slane %v295_v1, %v2640_v23  ;;  %v281_v4 = vrot.slane %v280_v55, 4  ;;  %v305_v7 = vshrl.u32 %v280_v55, 16 }
 0x2aa   :  { %607 = vmatpush.bf16.xpose.msra.mxu3 %v598_v2  ;;  %v617_v5 = vsel %vm574_vm7, %v440_v62, 0  ;;  %v443_v6 = vpack.i.b16 %v442_v0, %v441_v63  ;;  %vm83_vm8 = vcmp.le.s32.totalorder %v82_v22, %v80_v21 }
 0x2ab   :  { %626 = vmatpush.bf16.xpose.msrb.mxu0 %v617_v5  ;;  %v304_v9 = vpack.i.b16 %v299_v3, %v280_v55  ;;  %v306_v10 = vshrl.u32 %v299_v3, 16  ;;  %v282_v11 = vsel %vm222_vm6, 0, %v281_v4  ;;  %v300_v12 = vrot.slane %v299_v3, 4 }
 0x2ac   :  { %v636_v13 = vsel %vm574_vm7, %v443_v6, 0  ;;  %v311_v17 = vshrl.u32 %v282_v11, 16  ;;  %v2708_v25 = vsel %vm83_vm8, 0.0, %v2493_v24 }
 0x2ad   :  { %645 = vmatpush.bf16.xpose.msrb.mxu1 %v636_v13  ;;  %v307_v14 = vpack.i.b16 %v306_v10, %v305_v7  ;;  %v301_v15 = vsel %vm222_vm6, 0, %v300_v12 }
 0x2ae   :  { %v310_v16 = vpack.i.b16 %v301_v15, %v282_v11  ;;  %v312_v18 = vshrl.u32 %v301_v15, 16  ;;  %2214 = vmatmul.msk.bf16.vlgmr.msra.gmra.mxu2 %vm574_vm7, %v304_v9  ;;  %v453_v46 = vpop.permute.xlu2 %452 }
 0x2af   :  { %v463_v7 = vshrl.u32 %v453_v46, 16 }
 0x2b0   :  { %v313_v19 = vpack.i.b16 %v312_v18, %v311_v17 }
 0x2b1   :  { %2215 = vmatmul.msk.bf16.vlgmr.msra.gmra.mxu3 %vm574_vm7, %v307_v14 }
 0x2b2   :  { %2216 = vmatmul.msk.bf16.vlgmr.msrb.gmra.mxu0 %vm574_vm7, %v310_v16 }
 0x2b4   :  { %2217 = vmatmul.msk.bf16.vlgmr.msrb.gmra.mxu1 %vm574_vm7, %v313_v19 }
 0x32f   :  { %v628_v26 = vpop.f32.mrf.mxu0 }
 0x330   :  { %v629_v27 = vadd.f32 %v628_v26, %v2708_v25 }
 0x331   :  { %v647_v28 = vpop.f32.mrf.mxu1  ;;  %v590_v31 = vpop.f32.mrf.mxu2 }
 0x332   :  { %v648_v29 = vadd.f32 %v647_v28, %v2708_v25  ;;  %v657_v32 = vsel %vm574_vm7, %v629_v27, -inf  ;;  %v591_v33 = vadd.f32 %v590_v31, %v2708_v25 }
 0x333   :  { %658 = vmax.xlane.f32.xlu1 %v657_v32 }
 0x334   :  { %v609_v34 = vpop.f32.mrf.mxu3  ;;  %v660_v35 = vsel %vm574_vm7, %v648_v29, -inf  ;;  %v651_v36 = vsel %vm574_vm7, %v591_v33, -inf }
 0x335   :  { %661 = vmax.xlane.f32.xlu0 %v660_v35  ;;  %652 = vmax.xlane.f32.xlu2 %v651_v36  ;;  %v610_v38 = vadd.f32 %v609_v34, %v2708_v25 }
 0x337   :  { %v630_v37 = vpop.f32.mrf.mxu0  ;;  %v654_v42 = vsel %vm574_vm7, %v610_v38, -inf }
 0x339   :  { %v649_v39 = vpop.f32.mrf.mxu1  ;;  %v592_v40 = vpop.f32.mrf.mxu2 }
 0x33c   :  { %v611_v41 = vpop.f32.mrf.mxu3 }
 0x33d   :  { %655 = vmax.xlane.f32.xlu0 %v654_v42 }
 0x34c   :  { %458 = vrot.lane.b32.xlu1 %v451_v43, %s2490_s1 }
 0x34d   :  { %454 = vrot.lane.b32.xlu2 %v447_v44, %s2490_s1 }
 0x351   :  { %456 = vrot.lane.b32.xlu0 %v449_v45, %s2490_s1 }
 0x3a6   :  { %v659_v47 = vpop.xlane.xlu1 %658 }
 0x3a7   :  { %v665_v48 = vsub.f32 %v629_v27, %v659_v47 }
 0x3a8   :  { %v662_v49 = vpop.xlane.xlu0 %661  ;;  %v653_v52 = vpop.xlane.xlu2 %652 }
 0x3a9   :  { %v671_v50 = vmul.f32 1.442695, %v665_v48  ;;  %v663_v53 = vsub.f32 %v591_v33, %v653_v52  ;;  %v666_v54 = vsub.f32 %v648_v29, %v662_v49 }
 0x3ab   :  { %2392 = vpow2.f32 %v671_v50  ;;  %v667_v55 = vmul.f32 1.442695, %v663_v53  ;;  %v673_v57 = vmul.f32 1.442695, %v666_v54 }
 0x3ad   :  { %2394 = vpow2.f32 %v667_v55 }
 0x3ae   :  { %2396 = vpow2.f32 %v673_v57 }
 0x3b0   :  { %v656_v58 = vpop.xlane.xlu0 %655  ;;  %v455_v1 = vpop.permute.xlu2 %454 }
 0x3b1   :  { %v2721_v59 = vpop.eup %2392  ;;  %v664_v60 = vsub.f32 %v610_v38, %v656_v58  ;;  %v464_v4 = vshrl.u32 %v455_v1, 16  ;;  %v462_v9 = vpack.i.b16 %v455_v1, %v453_v46 }
 0x3b2   :  { %v681_v61 = vsel %vm574_vm7, %v2721_v59, 0.0 }
 0x3b3   :  { %v669_v62 = vmul.f32 1.442695, %v664_v60  ;;  %682 = vadd.xlane.f32.xlu1 %v681_v61  ;;  %v2725_v63 = vpop.eup %2394  ;;  %v465_v10 = vpack.i.b16 %v464_v4, %v463_v7  ;;  %v476_v12 = vperm.slane %v462_v9, %v2636_v8 }
 0x3b4   :  { %v675_v0 = vsel %vm574_vm7, %v2725_v63, 0.0  ;;  %v2729_v2 = vpop.eup %2396 }
 0x3b5   :  { %2398 = vpow2.f32 %v669_v62  ;;  %676 = vadd.xlane.f32.xlu2 %v675_v0  ;;  %v684_v6 = vsel %vm574_vm7, %v2729_v2, 0.0  ;;  %v502_v14 = vperm.slane %v465_v10, %v2636_v8  ;;  %v484_v18 = vrot.slane %v476_v12, 4 }
 0x3b7   :  { %v510_v21 = vrot.slane %v502_v14, 4 }
 0x3bb   :  { %v2731_v3 = vpop.eup %2398 }
 0x3bc   :  { %v678_v5 = vsel %vm574_vm7, %v2731_v3, 0.0 }
 0x3bd   :  { %679 = vadd.xlane.f32.xlu0 %v678_v5  ;;  %685 = vadd.xlane.f32.xlu2 %v684_v6 }
 0x3be   :  { %v459_v11 = vpop.permute.xlu1 %458 }
 0x3bf   :  { %v470_v15 = vshrl.u32 %v459_v11, 16 }
 0x3c3   :  { %v457_v13 = vpop.permute.xlu0 %456 }
 0x3c4   :  { %v468_v16 = vpack.i.b16 %v459_v11, %v457_v13  ;;  %v469_v17 = vshrl.u32 %v457_v13, 16 }
 0x3c6   :  { %v471_v19 = vpack.i.b16 %v470_v15, %v469_v17  ;;  %v481_v20 = vperm.slane %v468_v16, %v2636_v8 }
 0x3c8   :  { %v482_v22 = vrot.slane %v481_v20, 4  ;;  %v485_v24 = vsel %vm222_vm6, %v481_v20, %v484_v18  ;;  %v507_v26 = vperm.slane %v471_v19, %v2636_v8 }
 0x3c9   :  { %v493_v27 = vperm.slane %v485_v24, %v2640_v23 }
 0x3ca   :  { %v483_v28 = vsel %vm222_vm6, %v482_v22, %v476_v12  ;;  %v508_v29 = vrot.slane %v507_v26, 4  ;;  %v511_v31 = vsel %vm222_vm6, %v507_v26, %v510_v21 }
 0x3cb   :  { %v489_v32 = vperm.slane %v483_v28, %v2640_v23  ;;  %v496_v33 = vrot.slane %v493_v27, 4  ;;  %v519_v34 = vperm.slane %v511_v31, %v2640_v23 }
 0x3cc   :  { %v509_v35 = vsel %vm222_vm6, %v508_v29, %v502_v14 }
 0x3cd   :  { %v494_v36 = vrot.slane %v489_v32, 4  ;;  %v497_v37 = vsel %vm222_vm6, 0, %v496_v33  ;;  %v515_v38 = vperm.slane %v509_v35, %v2640_v23  ;;  %v522_v39 = vrot.slane %v519_v34, 4 }
 0x3ce   :  { %v529_v40 = vrot.slane %v497_v37, 4  ;;  %v524_v45 = vsel %vm222_vm6, %v496_v33, %v489_v32 }
 0x3cf   :  { %v495_v41 = vsel %vm222_vm6, 0, %v494_v36  ;;  %v520_v42 = vrot.slane %v515_v38, 4  ;;  %v523_v43 = vsel %vm222_vm6, 0, %v522_v39  ;;  %v543_v49 = vsel %vm222_vm6, %v522_v39, %v515_v38 }
 0x3d0   :  { %v548_v44 = vrot.slane %v523_v43, 4  ;;  %v530_v46 = vsel %vm222_vm6, %v529_v40, %v495_v41  ;;  %v528_v52 = vperm.slane %v524_v45, %v2636_v8  ;;  %v547_v57 = vperm.slane %v543_v49, %v2636_v8 }
 0x3d1   :  { %v521_v47 = vsel %vm222_vm6, 0, %v520_v42  ;;  %v534_v48 = vperm.slane %v530_v46, %v2636_v8 }
 0x3d2   :  { %v549_v50 = vsel %vm222_vm6, %v548_v44, %v521_v47 }
 0x3d3   :  { %v535_v53 = vrot.slane %v534_v48, 4  ;;  %v553_v54 = vperm.slane %v549_v50, %v2636_v8 }
 0x3d5   :  { %v536_v55 = vsel %vm222_vm6, %v535_v53, %v528_v52  ;;  %v554_v58 = vrot.slane %v553_v54, 4 }
 0x3d6   :  { %v540_v60 = vperm.slane %v536_v55, %v2640_v23 }
 0x3d7   :  { %v555_v61 = vsel %vm222_vm6, %v554_v58, %v547_v57 }
 0x3d8   :  { %v559_v62 = vperm.slane %v555_v61, %v2640_v23  ;;  %v541_v0 = vrot.slane %v540_v60, 4  ;;  %v565_v1 = vshrl.u32 %v540_v60, 16 }
 0x3da   :  { %v564_v4 = vpack.i.b16 %v559_v62, %v540_v60  ;;  %v566_v5 = vshrl.u32 %v559_v62, 16  ;;  %v542_v6 = vsel %vm222_vm6, 0, %v541_v0  ;;  %v560_v7 = vrot.slane %v559_v62, 4 }
 0x3db   :  { %v571_v13 = vshrl.u32 %v542_v6, 16 }
 0x3dc   :  { %v756_v9 = vsel %vm754_vm9, %v564_v4, 0  ;;  %v567_v10 = vpack.i.b16 %v566_v5, %v565_v1  ;;  %v561_v11 = vsel %vm222_vm6, 0, %v560_v7 }
 0x3dd   :  { %765 = vmatpush.bf16.msrb.mxu2 %v756_v9  ;;  %v570_v12 = vpack.i.b16 %v561_v11, %v542_v6  ;;  %v572_v14 = vshrl.u32 %v561_v11, 16 }
 0x3de   :  { %v775_v15 = vsel %vm754_vm9, %v567_v10, 0 }
 0x3df   :  { %784 = vmatpush.bf16.msrb.mxu3 %v775_v15  ;;  %v794_v16 = vsel %vm754_vm9, %v570_v12, 0  ;;  %v573_v17 = vpack.i.b16 %v572_v14, %v571_v13 }
 0x3e0   :  { %803 = vmatpush.bf16.msra.mxu0 %v794_v16 }
 0x3e1   :  { %v813_v18 = vsel %vm754_vm9, %v573_v17, 0 }
 0x3e2   :  { %822 = vmatpush.bf16.msra.mxu1 %v813_v18 }
 0x426   :  { %v683_v19 = vpop.xlane.xlu1 %682 }
 0x427   :  { %2400 = vrcp.f32 %v683_v19  ;;  %v728_v28 = vand.u32 2147483648, %v683_v19  ;;  %v726_v33 = vand.u32 2147483647, %v683_v19  ;;  %vm722_vm11 = vweird.f32 %v683_v19 }
 0x428   :  { %v677_v20 = vpop.xlane.xlu2 %676 }
 0x429   :  { %2402 = vrcp.f32 %v677_v20  ;;  %v698_v36 = vand.u32 2147483648, %v677_v20  ;;  %v729_v37 = vor.u32 1.1754944e-38, %v728_v28  ;;  %v696_v39 = vand.u32 2147483647, %v677_v20 }
 0x42a   :  { %vm727_vm14 = vcmp.eq.f32.partialorder %v726_v33, 8.507059e+37  ;;  %vm692_vm15 = vweird.f32 %v677_v20 }
 0x42b   :  { %v699_v46 = vor.u32 1.1754944e-38, %v698_v36  ;;  %vm697_vm2 = vcmp.eq.f32.partialorder %v696_v39, 8.507059e+37 }
 0x42d   :  { %v2401_v21 = vpop.eup %2400 }
 0x42e   :  { %v718_v22 = vmul.f32 %v2401_v21, %v683_v19  ;;  %vm723_vm10 = vweird.f32 %v2401_v21 }
 0x42f   :  { %v2403_v24 = vpop.eup %2402  ;;  %vm724_vm12 = vmor %vm722_vm11, %vm723_vm10 }
 0x430   :  { %v719_v26 = vsub.f32 1.0, %v718_v22  ;;  %v680_v27 = vpop.xlane.xlu0 %679  ;;  %v688_v29 = vmul.f32 %v2403_v24, %v677_v20  ;;  %v686_v31 = vpop.xlane.xlu2 %685  ;;  %vm693_vm13 = vweird.f32 %v2403_v24 }
 0x431   :  { %2404 = vrcp.f32 %v680_v27  ;;  %vm694_vm0 = vmor %vm692_vm15, %vm693_vm13  ;;  %v713_v54 = vand.u32 2147483648, %v680_v27  ;;  %v711_v60 = vand.u32 2147483647, %v680_v27  ;;  %v743_v61 = vand.u32 2147483648, %v686_v31 }
 0x432   :  { %v720_v32 = vmul.f32 %v2401_v21, %v719_v26  ;;  %2406 = vrcp.f32 %v686_v31  ;;  %v689_v34 = vsub.f32 1.0, %v688_v29  ;;  %v741_v62 = vand.u32 2147483647, %v686_v31 }
 0x433   :  { %vm707_vm5 = vweird.f32 %v680_v27  ;;  %v714_v4 = vor.u32 1.1754944e-38, %v713_v54  ;;  %vm737_vm10 = vweird.f32 %v686_v31  ;;  %vm712_vm11 = vcmp.eq.f32.partialorder %v711_v60, 8.507059e+37 }
 0x434   :  { %v721_v35 = vadd.f32 %v2401_v21, %v720_v32  ;;  %v690_v38 = vmul.f32 %v2403_v24, %v689_v34  ;;  %vm742_vm13 = vcmp.eq.f32.partialorder %v741_v62, 8.507059e+37  ;;  %vm954_vm15 = vcmask 195584  }
 0x436   :  { %v725_v40 = vsel %vm724_vm12, %v2401_v21, %v721_v35  ;;  %v691_v43 = vadd.f32 %v2403_v24, %v690_v38 }
 0x437   :  { %v2405_v41 = vpop.eup %2404  ;;  %v730_v42 = vsel %vm727_vm14, %v729_v37, %v725_v40  ;;  %vm952_vm14 = vcmask 130048  }
 0x438   :  { %v2407_v44 = vpop.eup %2406  ;;  %v731_v45 = vmul.f32 %v2721_v59, %v730_v42  ;;  %v703_v47 = vmul.f32 %v2405_v41, %v680_v27  ;;  %v695_v49 = vsel %vm694_vm0, %v2403_v24, %v691_v43  ;;  %vm708_vm3 = vweird.f32 %v2405_v41 }
 0x439   :  { %v733_v48 = vmul.f32 %v2407_v44, %v686_v31  ;;  %v700_v53 = vsel %vm697_vm2, %v699_v46, %v695_v49  ;;  %vm738_vm4 = vweird.f32 %v2407_v44  ;;  %vm709_vm8 = vmor %vm707_vm5, %vm708_vm3 }
 0x43a   :  { %v704_v50 = vsub.f32 1.0, %v703_v47  ;;  %v749_v52 = vpack.c.bf16 %v731_v45, %v731_v45  ;;  %v701_v57 = vmul.f32 %v2725_v63, %v700_v53  ;;  %vm739_vm12 = vmor %vm737_vm10, %vm738_vm4  ;;  %v744_v63 = vor.u32 1.1754944e-38, %v743_v61 }
 0x43b   :  { %v734_v55 = vsub.f32 1.0, %v733_v48 }
 0x43c   :  { %v705_v58 = vmul.f32 %v2405_v41, %v704_v50  ;;  %2220 = vmatmul.msk.bf16.vlgmr.msra.gmra.mxu0 %vm574_vm7, %v749_v52  ;;  %v747_v0 = vpack.c.bf16 %v701_v57, %v701_v57 }
 0x43d   :  { %v735_v59 = vmul.f32 %v2407_v44, %v734_v55 }
 0x43e   :  { %v706_v1 = vadd.f32 %v2405_v41, %v705_v58  ;;  %2218 = vmatmul.msk.bf16.vlgmr.msrb.gmra.mxu2 %vm574_vm7, %v747_v0 }
 0x43f   :  { %v736_v5 = vadd.f32 %v2407_v44, %v735_v59 }
 0x440   :  { %v710_v6 = vsel %vm709_vm8, %v2405_v41, %v706_v1 }
 0x441   :  { %v740_v7 = vsel %vm739_vm12, %v2407_v44, %v736_v5  ;;  %v715_v9 = vsel %vm712_vm11, %v714_v4, %v710_v6  ;;  %vm1104_vm11 = vcmask 523264  }
 0x442   :  { %v745_v10 = vsel %vm742_vm13, %v744_v63, %v740_v7  ;;  %v716_v11 = vmul.f32 %v2731_v3, %v715_v9 }
 0x443   :  { %v746_v12 = vmul.f32 %v2729_v2, %v745_v10 }
 0x444   :  { %v748_v13 = vpack.c.bf16 %v716_v11, %v716_v11 }
 0x445   :  { %v750_v14 = vpack.c.bf16 %v746_v12, %v746_v12 }
 0x446   :  { %2219 = vmatmul.msk.bf16.vlgmr.msrb.gmra.mxu3 %vm574_vm7, %v748_v13 }
 0x447   :  { %2221 = vmatmul.msk.bf16.vlgmr.msra.gmra.mxu1 %vm574_vm7, %v750_v14 }
 0x4b9   :  { %v805_v15 = vpop.f32.mrf.mxu0 }
 0x4ba   :  { %v828_v17 = vrot.slane %v805_v15, 4 }
 0x4c1   :  { %v807_v16 = vpop.f32.mrf.mxu0  ;;  %v767_v18 = vpop.f32.mrf.mxu2 }
 0x4c2   :  { %v831_v19 = vrot.slane %v767_v18, 4  ;;  %v830_v20 = vsel %vm222_vm6, %v828_v17, %v767_v18 }
 0x4c3   :  { %v836_v3 = vperm.slane %v830_v20, %v2636_v8 }
 0x4c4   :  { %v824_v21 = vpop.f32.mrf.mxu1  ;;  %v832_v22 = vsel %vm222_vm6, %v805_v15, %v831_v19 }
 0x4c5   :  { %v841_v24 = vrot.slane %v824_v21, 4  ;;  %v840_v2 = vperm.slane %v832_v22, %v2636_v8  ;;  %v855_v31 = vrot.slane %v836_v3, 4 }
 0x4c7   :  { %v867_v35 = vrot.slane %v840_v2, 4 }
 0x4c9   :  { %v786_v26 = vpop.f32.mrf.mxu3  ;;  %v769_v29 = vpop.f32.mrf.mxu2 }
 0x4ca   :  { %v842_v27 = vsel %vm222_vm6, %v841_v24, %v786_v26  ;;  %v843_v28 = vrot.slane %v786_v26, 4 }
 0x4cb   :  { %v848_v32 = vperm.slane %v842_v27, %v2636_v8  ;;  %v2349_v27 = vld [vmem:[%s3162_s6 + $0x8] sm:$0xff] }
 0x4cc   :  { %v844_v33 = vsel %vm222_vm6, %v824_v21, %v843_v28  ;;  %v826_v34 = vpop.f32.mrf.mxu1  ;;  %990 = vmatpush.bf16.msra.mxu2 %v2349_v27  ;;  %v2348_v28 = vld [vmem:[%s3162_s6] sm:$0xff] }
 0x4cd   :  { %v852_v36 = vperm.slane %v844_v33, %v2636_v8  ;;  %v853_v37 = vrot.slane %v848_v32, 4  ;;  %v856_v38 = vsel %vm222_vm6, %v848_v32, %v855_v31 }
 0x4ce   :  { %v864_v39 = vperm.slane %v856_v38, %v2640_v23  ;;  %v2440_v38 = vld [vmem:[#allocation2] sm:$0xff] }
 0x4cf   :  { %v854_v40 = vsel %vm222_vm6, %v853_v37, %v836_v3  ;;  %v865_v41 = vrot.slane %v852_v36, 4  ;;  %v868_v42 = vsel %vm222_vm6, %v852_v36, %v867_v35 }
 0x4d0   :  { %v860_v43 = vperm.slane %v854_v40, %v2640_v23  ;;  %v876_v44 = vperm.slane %v868_v42, %v2640_v23  ;;  %v879_v45 = vrot.slane %v864_v39, 4  ;;  %991 = vmatpush.bf16.msra.mxu2 %v2348_v28  ;;  %v2274_v28 = vld [vmem:[%s3160_s4 + $0x30] sm:$0xf] }
 0x4d1   :  { %v866_v46 = vsel %vm222_vm6, %v865_v41, %v840_v2  ;;  %v788_v47 = vpop.f32.mrf.mxu3 }
 0x4d2   :  { %v872_v48 = vperm.slane %v866_v46, %v2640_v23  ;;  %v877_v49 = vrot.slane %v860_v43, 4  ;;  %v880_v50 = vsel %vm222_vm6, 0.0, %v879_v45  ;;  %v883_v52 = vrot.slane %v876_v44, 4  ;;  %v2354_v44 = vld [vmem:[%s3161_s5] sm:$0xff] }
 0x4d3   :  { %v885_v53 = vsel %vm222_vm6, %v879_v45, %v860_v43  ;;  %v890_v54 = vrot.slane %v880_v50, 4  ;;  %v2355_v43 = vld [vmem:[%s3161_s5 + $0x8] sm:$0xff] }
 0x4d4   :  { %v878_v55 = vsel %vm222_vm6, 0.0, %v877_v49  ;;  %v881_v57 = vrot.slane %v872_v48, 4  ;;  %v884_v58 = vsel %vm222_vm6, 0.0, %v883_v52  ;;  %v889_v60 = vperm.slane %v885_v53, %v2636_v8  ;;  %1047 = vmatpush.bf16.msra.mxu3 %v2355_v43 }
 0x4d5   :  { %v901_v61 = vrot.slane %v884_v58, 4  ;;  %v891_v59 = vsel %vm222_vm6, %v890_v54, %v878_v55  ;;  %v896_v62 = vsel %vm222_vm6, %v883_v52, %v872_v48  ;;  %v2384_v55 = vld [vmem:[%s3159_s3 + $0x1] ss:$0 sm:$0xff] }
 0x4d6   :  { %v882_v0 = vsel %vm222_vm6, 0.0, %v881_v57  ;;  %v895_v1 = vperm.slane %v891_v59, %v2636_v8  ;;  %v900_v4 = vperm.slane %v896_v62, %v2636_v8  ;;  %v909_v5 = vrot.slane %v889_v60, 4  ;;  %v2353_v59 = vld [vmem:[%s3162_s6 + $0x28] sm:$0xff]  ;;  %v2352_v62 = vld [vmem:[%s3162_s6 + $0x20] sm:$0xff] }
 0x4d7   :  { %v902_v63 = vsel %vm222_vm6, %v901_v61, %v882_v0  ;;  %1112 = vmatpush.bf16.msrb.mxu0 %v2353_v59  ;;  %v2351_v0 = vld [vmem:[%s3162_s6 + $0x18] sm:$0xff] }
 0x4d8   :  { %v906_v6 = vperm.slane %v902_v63, %v2636_v8  ;;  %v910_v7 = vsel %vm222_vm6, %v895_v1, %v909_v5  ;;  %v921_v9 = vrot.slane %v900_v4, 4  ;;  %v907_v10 = vrot.slane %v895_v1, 4  ;;  %1048 = vmatpush.bf16.msra.mxu3 %v2354_v44 }
 0x4d9   :  { %v918_v11 = vperm.slane %v910_v7, %v2640_v23  ;;  %v2350_v7 = vld [vmem:[%s3162_s6 + $0x10] sm:$0xff] }
 0x4da   :  { %v922_v12 = vsel %vm222_vm6, %v906_v6, %v921_v9  ;;  %v908_v13 = vsel %vm222_vm6, %v907_v10, %v889_v60  ;;  %v919_v14 = vrot.slane %v906_v6, 4 }
 0x4db   :  { %v930_v15 = vperm.slane %v922_v12, %v2640_v23  ;;  %v937_v16 = vrot.slane %v918_v11, 4  ;;  %v914_v17 = vperm.slane %v908_v13, %v2640_v23  ;;  %1113 = vmatpush.bf16.msrb.mxu0 %v2352_v62 }
 0x4dc   :  { %v920_v18 = vsel %vm222_vm6, %v919_v14, %v900_v4 }
 0x4dd   :  { %v938_v19 = vsel %vm222_vm6, %v930_v15, %v937_v16  ;;  %v935_v20 = vrot.slane %v930_v15, 4  ;;  %v926_v21 = vperm.slane %v920_v18, %v2640_v23  ;;  %v933_v22 = vrot.slane %v914_v17, 4 }
 0x4de   :  { %948 = vrot.lane.b32.xlu2 %v938_v19, %s2494_s0 }
 0x4df   :  { %v936_v3 = vsel %vm222_vm6, %v935_v20, %v918_v11  ;;  %v931_v24 = vrot.slane %v926_v21, 4  ;;  %v934_v2 = vsel %vm222_vm6, %v926_v21, %v933_v22  ;;  %1114 = vmatpush.bf16.msrb.mxu0 %v2351_v0 }
 0x4e0   :  { %944 = vrot.lane.b32.xlu1 %v936_v3, %s2495_s15  ;;  %940 = vrot.lane.b32.xlu0 %v934_v2, %s2496_s16 }
 0x4e1   :  { %v932_v26 = vsel %vm222_vm6, %v931_v24, %v914_v17 }
 0x4e3   :  { %1115 = vmatpush.bf16.msrb.mxu0 %v2350_v7 }
 0x538   :  { %v949_v33 = vpop.permute.xlu2 %948 }
 0x552   :  { %v945_v29 = vpop.permute.xlu1 %944  ;;  %v941_v31 = vpop.permute.xlu0 %940 }
 0x553   :  { %v951_v32 = vsel %vm574_vm7, %v932_v26, %v941_v31  ;;  %v2358_v31 = vld [vmem:[%s3160_s4 + $0x34] sm:$0xf] }
 0x554   :  { %v953_v34 = vsel %vm952_vm14, %v951_v32, %v945_v29  ;;  %v2359_v29 = vld [vmem:[%s3160_s4 + $0x34] sm:$0xf0] }
 0x555   :  { %v955_v35 = vsel %vm954_vm15, %v953_v34, %v949_v33  ;;  %v2275_v32 = vor.u32 %v2359_v29, %v2274_v28  ;;  %v2276_v33 = vld [vmem:[%s3160_s4 + $0x38] sm:$0xf0] }
 0x556   :  { %v968_v36 = vpack.c.bf16 %v955_v35, %v955_v35  ;;  %v2279_v34 = vor.u32 %v2358_v31, %v2276_v33  ;;  %v2266_v35 = vld [vmem:[%s3160_s4 + $0x20] sm:$0xf] }
 0x557   :  { %1180 = vmatpush.bf16.msrb.mxu1 %v2275_v32 }
 0x558   :  { %2230 = vmatmul.msk.bf16.vlgmr.msra.gmra.mxu2 %vm87_vm1, %v968_v36  ;;  %v2357_v36 = vld [vmem:[%s3160_s4 + $0x24] sm:$0xf0] }
 0x559   :  { %1193 = vmatpush.bf16.msrb.mxu2 %v2279_v34 }
 0x5db   :  { %v993_v37 = vpop.f32.mrf.mxu2 }
 0x5dc   :  { %v2832_v39 = vadd.f32 %v2440_v38, %v993_v37  ;;  %v2356_v37 = vld [vmem:[%s3160_s4 + $0x24] sm:$0xf]  ;;  %v2267_v38 = vor.u32 %v2357_v36, %v2266_v35 }
 0x5de   :  { %v1000_v40 = vmul.f32 %v2832_v39, %v2832_v39  ;;  %1181 = vmatpush.bf16.msrb.mxu1 %v2267_v38 }
 0x5e0   :  { %v1001_v41 = vsel %vm87_vm1, %v1000_v40, 0.0 }
 0x5e1   :  { %1002 = vadd.xlane.f32.xlu0 %v1001_v41 }
 0x5e3   :  { %v995_v42 = vpop.f32.mrf.mxu2 }
 0x654   :  { %v1003_v45 = vpop.xlane.xlu0 %1002 }
 0x655   :  { %v1004_v46 = vmul.f32 %v1003_v45, %v2601_v30 }
 0x657   :  { %v1005_v47 = vadd.f32 1e-06, %v1004_v46 }
 0x659   :  { %2408 = vrsqrt.f32 %v1005_v47  ;;  %vm1012_vm2 = vweird.f32 %v1005_v47 }
 0x65f   :  { %v2409_v48 = vpop.eup %2408 }
 0x660   :  { %v1007_v49 = vmul.f32 %v2409_v48, %v1005_v47  ;;  %vm1013_vm0 = vweird.f32 %v2409_v48 }
 0x661   :  { %vm1014_vm3 = vmor %vm1012_vm2, %vm1013_vm0 }
 0x662   :  { %v1008_v50 = vmul.f32 %v2409_v48, %v1007_v49 }
 0x664   :  { %v1009_v52 = vmul.f32 0.5, %v1008_v50  ;;  %v2385_v50 = vld [vmem:[%s3159_s3 + $0x2] ss:$0 sm:$0xff] }
 0x666   :  { %v1010_v53 = vsub.f32 1.5, %v1009_v52 }
 0x668   :  { %v1011_v54 = vmul.f32 %v2409_v48, %v1010_v53 }
 0x66a   :  { %v1015_v57 = vsel %vm1014_vm3, %v2409_v48, %v1011_v54 }
 0x66b   :  { %v1016_v58 = vmul.f32 %v1015_v57, %v2832_v39 }
 0x66d   :  { %v1020_v60 = vmul.f32 %v2384_v55, %v1016_v58 }
 0x66f   :  { %v1021_v61 = vpack.c.bf16 %v1020_v60, %v1020_v60 }
 0x671   :  { %2240 = vmatmul.msk.bf16.vlgmr.msra.gmra.mxu3 %vm87_vm1, %v1021_v61  ;;  %v2441_v61 = vld [vmem:[%s3158_s2 + $0x8] sm:$0xff] }
 0x6f4   :  { %v1050_v1 = vpop.f32.mrf.mxu3 }
 0x6f5   :  { %1075 = vrot.lane.b32.xlu1 %v1050_v1, %s2490_s1  ;;  %v2241_v5 = vmul.f32 -1.442695, %v1050_v1 }
 0x6f7   :  { %2410 = vpow2.f32 %v2241_v5 }
 0x6fc   :  { %v1052_v4 = vpop.f32.mrf.mxu3 }
 0x6fd   :  { %v2411_v63 = vpop.eup %2410 }
 0x6fe   :  { %v1057_v6 = vadd.f32 1.0, %v2411_v63 }
 0x700   :  { %2412 = vrcp.f32 %v1057_v6  ;;  %v1069_v14 = vand.u32 2147483648, %v1057_v6  ;;  %vm1063_vm5 = vweird.f32 %v1057_v6  ;;  %v1067_v15 = vand.u32 2147483647, %v1057_v6 }
 0x702   :  { %v1070_v17 = vor.u32 1.1754944e-38, %v1069_v14  ;;  %vm1068_vm10 = vcmp.eq.f32.partialorder %v1067_v15, 8.507059e+37 }
 0x706   :  { %v2413_v9 = vpop.eup %2412 }
 0x707   :  { %v1059_v10 = vmul.f32 %v2413_v9, %v1057_v6  ;;  %vm1064_vm4 = vweird.f32 %v2413_v9  ;;  %v2442_v6 = vld [vmem:[%s3158_s2] sm:$0xff] }
 0x708   :  { %vm1065_vm8 = vmor %vm1063_vm5, %vm1064_vm4 }
 0x709   :  { %v1060_v11 = vsub.f32 1.0, %v1059_v10 }
 0x70b   :  { %v1061_v12 = vmul.f32 %v2413_v9, %v1060_v11 }
 0x70d   :  { %v1062_v13 = vadd.f32 %v2413_v9, %v1061_v12 }
 0x70f   :  { %v1066_v16 = vsel %vm1065_vm8, %v2413_v9, %v1062_v13 }
 0x710   :  { %v1071_v18 = vsel %vm1068_vm10, %v1070_v17, %v1066_v16 }
 0x711   :  { %v1073_v19 = vmul.f32 %v1071_v18, %v1050_v1 }
 0x767   :  { %v1076_v20 = vpop.permute.xlu1 %1075 }
 0x768   :  { %v1078_v21 = vmul.f32 %v1076_v20, %v1073_v19 }
 0x76a   :  { %v1079_v22 = vpack.c.bf16 %v1078_v21, %v1078_v21 }
 0x76c   :  { %2258 = vmatmul.msk.bf16.vlgmr.msrb.gmra.mxu0 %vm1104_vm11, %v1079_v22 }
 0x7e9   :  { %v1117_v3 = vpop.f32.mrf.mxu0 }
 0x7ea   :  { %v2864_v24 = vadd.f32 %v1117_v3, %v2832_v39  ;;  %v2268_v39 = vld [vmem:[%s3160_s4 + $0x28] sm:$0xf0] }
 0x7eb   :  { %v2271_v40 = vor.u32 %v2356_v37, %v2268_v39 }
 0x7ec   :  { %v1124_v2 = vmul.f32 %v2864_v24, %v2864_v24 }
 0x7ed   :  { %1194 = vmatpush.bf16.msrb.mxu2 %v2271_v40 }
 0x7ee   :  { %v1125_v26 = vsel %vm87_vm1, %v1124_v2, 0.0 }
 0x7ef   :  { %1126 = vadd.xlane.f32.xlu2 %v1125_v26 }
 0x7f1   :  { %v1119_v27 = vpop.f32.mrf.mxu0 }
 0x862   :  { %v1127_v41 = vpop.xlane.xlu2 %1126 }
 0x863   :  { %v1128_v42 = vmul.f32 %v1127_v41, %v2601_v30 }
 0x865   :  { %v1129_v43 = vadd.f32 1e-06, %v1128_v42 }
 0x867   :  { %2414 = vrsqrt.f32 %v1129_v43  ;;  %vm1136_vm13 = vweird.f32 %v1129_v43 }
 0x86d   :  { %v2415_v44 = vpop.eup %2414 }
 0x86e   :  { %v1131_v45 = vmul.f32 %v2415_v44, %v1129_v43  ;;  %vm1137_vm12 = vweird.f32 %v2415_v44 }
 0x86f   :  { %vm1138_vm0 = vmor %vm1136_vm13, %vm1137_vm12 }
 0x870   :  { %v1132_v46 = vmul.f32 %v2415_v44, %v1131_v45 }
 0x872   :  { %v1133_v47 = vmul.f32 0.5, %v1132_v46 }
 0x874   :  { %v1134_v48 = vsub.f32 1.5, %v1133_v47 }
 0x876   :  { %v1135_v49 = vmul.f32 %v2415_v44, %v1134_v48 }
 0x878   :  { %v1139_v52 = vsel %vm1138_vm0, %v2415_v44, %v1135_v49 }
 0x879   :  { %v1140_v53 = vmul.f32 %v1139_v52, %v2864_v24 }
 0x87b   :  { %v1144_v54 = vmul.f32 %v2385_v50, %v1140_v53 }
 0x87d   :  { %v1145_v55 = vpack.c.bf16 %v1144_v54, %v1144_v54 }
 0x87f   :  { %2280 = vmatmul.msk.bf16.vlgmr.msrb.gmra.mxu1 %vm87_vm1, %v1145_v55  ;;  %2281 = vmatmul.msk.bf16.vlgmr.msrb.gmra.mxu2 %vm87_vm1, %v1145_v55 }
 0x8fc   :  { %v1183_v57 = vpop.f32.mrf.mxu1 }
 0x8fd   :  { %v1201_v58 = vmul.f32 %v1183_v57, %v2622_v56  ;;  %v1207_v1 = vmul.f32 %v1183_v57, %v2615_v51  ;;  %v1200_v7 = vmul.f32 %v2442_v6, %v1183_v57  ;;  %v1466_v11 = vpack.c.bf16 %v1183_v57, %v1183_v57 }
 0x8ff   :  { %1203 = vrot.lane.b32.xlu0 %v1201_v58, %s2485_s29 }
 0x902   :  { %v1196_v60 = vpop.f32.mrf.mxu2 }
 0x903   :  { %v1208_v59 = vmul.f32 %v2441_v61, %v1196_v60 }
 0x904   :  { %v1185_v62 = vpop.f32.mrf.mxu1 }
 0x905   :  { %1210 = vrot.lane.b32.xlu1 %v1208_v59, %s2485_s29 }
 0x90a   :  { %v1198_v0 = vpop.f32.mrf.mxu2 }
 0x971   :  { %v1204_v56 = vpop.permute.xlu0 %1203 }
 0x972   :  { %v1206_v9 = vadd.f32 %v1204_v56, %v1200_v7 }
 0x974   :  { %v1214_v10 = vpack.c.bf16 %v1206_v9, %v1206_v9 }
 0x976   :  { %v1225_v31 = vshrl.u32 %v1214_v10, 16 }
 0x977   :  { %v1211_v4 = vpop.permute.xlu1 %1210 }
 0x978   :  { %v1213_v5 = vadd.f32 %v1211_v4, %v1207_v1 }
 0x97a   :  { %v1336_v63 = vpack.c.bf16 %v1213_v5, %v1213_v5 }
 0x97c   :  { %1338 = vrot.lane.b32.xlu1 %v1336_v63, %s2488_s10 }
 0x984   :  { %1340 = vrot.lane.b32.xlu1 %v1336_v63, %s2489_s14 }
 0x98c   :  { %1342 = vrot.lane.b32.xlu1 %v1336_v63, %s2487_s9 }
 0x994   :  { %1344 = vrot.lane.b32.xlu1 %v1336_v63, %s2486_s13 }
 0x99c   :  { %1216 = vrot.lane.b32.xlu1 %v1214_v10, %s2488_s10 }
 0x9ee   :  { %v1339_v51 = vpop.permute.xlu1 %1338 }
 0x9ef   :  { %1346 = vrot.lane.b32.xlu2 %v1339_v51, %s2486_s13 }
 0x9f6   :  { %v1341_v12 = vpop.permute.xlu1 %1340 }
 0x9f7   :  { %1468 = vrot.lane.b32.xlu2 %v1466_v11, %s2488_s10  ;;  %1348 = vrot.lane.b32.xlu1 %v1341_v12, %s2486_s13 }
 0x9fe   :  { %v1343_v13 = vpop.permute.xlu1 %1342 }
 0x9ff   :  { %1470 = vrot.lane.b32.xlu2 %v1466_v11, %s2489_s14  ;;  %1350 = vrot.lane.b32.xlu0 %v1343_v13, %s2486_s13 }
 0xa00   :  { %1220 = vrot.lane.b32.xlu1 %v1214_v10, %s2487_s9 }
 0xa06   :  { %v1345_v14 = vpop.permute.xlu1 %1344 }
 0xa07   :  { %1472 = vrot.lane.b32.xlu2 %v1466_v11, %s2487_s9  ;;  %1218 = vrot.lane.b32.xlu0 %v1214_v10, %s2489_s14  ;;  %v1355_v18 = vshrl.u32 %v1345_v14, 16 }
 0xa08   :  { %1474 = vrot.lane.b32.xlu1 %v1466_v11, %s2490_s1 }
 0xa0e   :  { %v1217_v15 = vpop.permute.xlu1 %1216 }
 0xa0f   :  { %v1226_v3 = vshrl.u32 %v1217_v15, 16  ;;  %v1224_v32 = vpack.i.b16 %v1217_v15, %v1214_v10 }
 0xa11   :  { %v1227_v36 = vpack.i.b16 %v1226_v3, %v1225_v31  ;;  %v1238_v43 = vperm.slane %v1224_v32, %v2636_v8 }
 0xa13   :  { %v1264_v47 = vperm.slane %v1227_v36, %v2636_v8  ;;  %v1246_v4 = vrot.slane %v1238_v43, 4 }
 0xa15   :  { %v1272_v10 = vrot.slane %v1264_v47, 4 }
 0xa49   :  { %v1347_v16 = vpop.permute.xlu2 %1346 }
 0xa4a   :  { %v1356_v17 = vshrl.u32 %v1347_v16, 16  ;;  %v1354_v19 = vpack.i.b16 %v1347_v16, %v1345_v14 }
 0xa4c   :  { %v1357_v21 = vpack.i.b16 %v1356_v17, %v1355_v18  ;;  %v1368_v22 = vperm.slane %v1354_v19, %v2636_v8 }
 0xa4e   :  { %v1394_v26 = vperm.slane %v1357_v21, %v2636_v8  ;;  %v1376_v33 = vrot.slane %v1368_v22, 4 }
 0xa50   :  { %v1402_v37 = vrot.slane %v1394_v26, 4 }
 0xa69   :  { %v1349_v20 = vpop.permute.xlu1 %1348 }
 0xa6a   :  { %v1361_v27 = vshrl.u32 %v1349_v20, 16 }
 0xa71   :  { %v1351_v2 = vpop.permute.xlu0 %1350 }
 0xa72   :  { %v1360_v28 = vpack.i.b16 %v1351_v2, %v1349_v20  ;;  %v1362_v29 = vshrl.u32 %v1351_v2, 16  ;;  %v1221_v42 = vpop.permute.xlu1 %1220 }
 0xa73   :  { %v1232_v54 = vshrl.u32 %v1221_v42, 16 }
 0xa74   :  { %v1363_v34 = vpack.i.b16 %v1362_v29, %v1361_v27  ;;  %v1373_v35 = vperm.slane %v1360_v28, %v2636_v8 }
 0xa76   :  { %v1374_v38 = vrot.slane %v1373_v35, 4  ;;  %v1377_v39 = vsel %vm222_vm6, %v1373_v35, %v1376_v33  ;;  %v1399_v40 = vperm.slane %v1363_v34, %v2636_v8 }
 0xa77   :  { %v1385_v41 = vperm.slane %v1377_v39, %v2640_v23 }
 0xa78   :  { %v1375_v44 = vsel %vm222_vm6, %v1374_v38, %v1368_v22  ;;  %v1400_v45 = vrot.slane %v1399_v40, 4  ;;  %v1403_v46 = vsel %vm222_vm6, %v1399_v40, %v1402_v37 }
 0xa79   :  { %v1381_v48 = vperm.slane %v1375_v44, %v2640_v23  ;;  %v1388_v49 = vrot.slane %v1385_v41, 4  ;;  %v1411_v50 = vperm.slane %v1403_v46, %v2640_v23  ;;  %v1219_v52 = vpop.permute.xlu0 %1218 }
 0xa7a   :  { %v1401_v53 = vsel %vm222_vm6, %v1400_v45, %v1394_v26  ;;  %v1230_v55 = vpack.i.b16 %v1221_v42, %v1219_v52  ;;  %v1231_v57 = vshrl.u32 %v1219_v52, 16 }
 0xa7b   :  { %v1386_v58 = vrot.slane %v1381_v48, 4  ;;  %v1389_v60 = vsel %vm222_vm6, 0, %v1388_v49  ;;  %v1407_v61 = vperm.slane %v1401_v53, %v2640_v23  ;;  %v1414_v59 = vrot.slane %v1411_v50, 4 }
 0xa7c   :  { %v1421_v62 = vrot.slane %v1389_v60, 4  ;;  %v1233_v0 = vpack.i.b16 %v1232_v54, %v1231_v57  ;;  %v1243_v1 = vperm.slane %v1230_v55, %v2636_v8  ;;  %v1416_v13 = vsel %vm222_vm6, %v1388_v49, %v1381_v48 }
 0xa7d   :  { %v1387_v5 = vsel %vm222_vm6, 0, %v1386_v58  ;;  %v1412_v63 = vrot.slane %v1407_v61, 4  ;;  %v1415_v56 = vsel %vm222_vm6, 0, %v1414_v59  ;;  %v1420_v2 = vperm.slane %v1416_v13, %v2636_v8 }
 0xa7e   :  { %v1422_v6 = vsel %vm222_vm6, %v1421_v62, %v1387_v5  ;;  %v1440_v7 = vrot.slane %v1415_v56, 4  ;;  %v1244_v9 = vrot.slane %v1243_v1, 4  ;;  %v1247_v11 = vsel %vm222_vm6, %v1243_v1, %v1246_v4 }
 0xa7f   :  { %v1413_v51 = vsel %vm222_vm6, 0, %v1412_v63  ;;  %v1269_v12 = vperm.slane %v1233_v0, %v2636_v8  ;;  %v1255_v15 = vperm.slane %v1247_v11, %v2640_v23  ;;  %v1426_v16 = vperm.slane %v1422_v6, %v2636_v8 }
 0xa80   :  { %v1245_v14 = vsel %vm222_vm6, %v1244_v9, %v1238_v43  ;;  %v1441_v20 = vsel %vm222_vm6, %v1440_v7, %v1413_v51  ;;  %v1435_v29 = vsel %vm222_vm6, %v1414_v59, %v1407_v61 }
 0xa81   :  { %v1251_v17 = vperm.slane %v1245_v14, %v2640_v23  ;;  %v1270_v18 = vrot.slane %v1269_v12, 4  ;;  %v1273_v19 = vsel %vm222_vm6, %v1269_v12, %v1272_v10  ;;  %v1258_v21 = vrot.slane %v1255_v15, 4 }
 0xa82   :  { %v1281_v22 = vperm.slane %v1273_v19, %v2640_v23  ;;  %v1427_v3 = vrot.slane %v1426_v16, 4  ;;  %v1445_v28 = vperm.slane %v1441_v20, %v2636_v8  ;;  %v1439_v42 = vperm.slane %v1435_v29, %v2636_v8 }
 0xa83   :  { %v1256_v26 = vrot.slane %v1251_v17, 4  ;;  %v1271_v27 = vsel %vm222_vm6, %v1270_v18, %v1264_v47  ;;  %v1259_v31 = vsel %vm222_vm6, 0, %v1258_v21  ;;  %v1286_v45 = vsel %vm222_vm6, %v1258_v21, %v1251_v17 }
 0xa84   :  { %v1277_v32 = vperm.slane %v1271_v27, %v2640_v23  ;;  %v1284_v33 = vrot.slane %v1281_v22, 4  ;;  %v1291_v35 = vrot.slane %v1259_v31, 4  ;;  %v1428_v36 = vsel %vm222_vm6, %v1427_v3, %v1420_v2 }
 0xa85   :  { %v1257_v34 = vsel %vm222_vm6, 0, %v1256_v26  ;;  %v1432_v39 = vperm.slane %v1428_v36, %v2640_v23  ;;  %v1446_v43 = vrot.slane %v1445_v28, 4  ;;  %v1290_v55 = vperm.slane %v1286_v45, %v2636_v8 }
 0xa86   :  { %v1282_v37 = vrot.slane %v1277_v32, 4  ;;  %v1285_v38 = vsel %vm222_vm6, 0, %v1284_v33  ;;  %v1292_v40 = vsel %vm222_vm6, %v1291_v35, %v1257_v34  ;;  %v1305_v52 = vsel %vm222_vm6, %v1284_v33, %v1277_v32 }
 0xa87   :  { %v1310_v41 = vrot.slane %v1285_v38, 4  ;;  %v1296_v46 = vperm.slane %v1292_v40, %v2636_v8  ;;  %v1433_v47 = vrot.slane %v1432_v39, 4  ;;  %v1447_v49 = vsel %vm222_vm6, %v1446_v43, %v1439_v42 }
 0xa88   :  { %v1283_v44 = vsel %vm222_vm6, 0, %v1282_v37  ;;  %v1451_v54 = vperm.slane %v1447_v49, %v2640_v23  ;;  %v1457_v57 = vshrl.u32 %v1432_v39, 16  ;;  %v1309_v0 = vperm.slane %v1305_v52, %v2636_v8  ;;  %v1475_v49 = vpop.permute.xlu1 %1474 }
 0xa89   :  { %v1311_v48 = vsel %vm222_vm6, %v1310_v41, %v1283_v44  ;;  %v1297_v50 = vrot.slane %v1296_v46, 4  ;;  %v1434_v58 = vsel %vm222_vm6, 0, %v1433_v47  ;;  %v1469_v44 = vpop.permute.xlu2 %1468 }
 0xa8a   :  { %v1315_v53 = vperm.slane %v1311_v48, %v2636_v8  ;;  %v1456_v61 = vpack.i.b16 %v1451_v54, %v1432_v39  ;;  %v1458_v59 = vshrl.u32 %v1451_v54, 16  ;;  %v1452_v62 = vrot.slane %v1451_v54, 4 }
 0xa8b   :  { %v1298_v1 = vsel %vm222_vm6, %v1297_v50, %v1290_v55  ;;  %v1463_v7 = vshrl.u32 %v1434_v58, 16 }
 0xa8c   :  { %v1316_v60 = vrot.slane %v1315_v53, 4  ;;  %v1600_v4 = vsel %vm574_vm7, %v1456_v61, 0  ;;  %v1459_v5 = vpack.i.b16 %v1458_v59, %v1457_v57  ;;  %v1453_v63 = vsel %vm222_vm6, 0, %v1452_v62 }
 0xa8d   :  { %v1302_v56 = vperm.slane %v1298_v1, %v2640_v23  ;;  %1609 = vmatpush.bf16.xpose.msrb.mxu3 %v1600_v4  ;;  %v1462_v6 = vpack.i.b16 %v1453_v63, %v1434_v58  ;;  %v1464_v9 = vshrl.u32 %v1453_v63, 16 }
 0xa8e   :  { %v1317_v10 = vsel %vm222_vm6, %v1316_v60, %v1309_v0  ;;  %v1619_v51 = vsel %vm574_vm7, %v1459_v5, 0 }
 0xa8f   :  { %v1321_v11 = vperm.slane %v1317_v10, %v2640_v23  ;;  %v1303_v12 = vrot.slane %v1302_v56, 4  ;;  %1628 = vmatpush.bf16.xpose.msra.mxu0 %v1619_v51  ;;  %v1638_v13 = vsel %vm574_vm7, %v1462_v6, 0  ;;  %v1465_v14 = vpack.i.b16 %v1464_v9, %v1463_v7 }
 0xa90   :  { %v1327_v15 = vshrl.u32 %v1302_v56, 16  ;;  %1647 = vmatpush.bf16.xpose.msra.mxu1 %v1638_v13  ;;  %v1485_v7 = vshrl.u32 %v1475_v49, 16 }
 0xa91   :  { %v1326_v16 = vpack.i.b16 %v1321_v11, %v1302_v56  ;;  %v1328_v17 = vshrl.u32 %v1321_v11, 16  ;;  %v1304_v18 = vsel %vm222_vm6, 0, %v1303_v12  ;;  %v1322_v19 = vrot.slane %v1321_v11, 4  ;;  %v1471_v46 = vpop.permute.xlu2 %1470 }
 0xa92   :  { %v1657_v20 = vsel %vm574_vm7, %v1465_v14, 0  ;;  %v1333_v2 = vshrl.u32 %v1304_v18, 16 }
 0xa93   :  { %1666 = vmatpush.bf16.xpose.msra.mxu2 %v1657_v20  ;;  %v1329_v21 = vpack.i.b16 %v1328_v17, %v1327_v15  ;;  %v1323_v22 = vsel %vm222_vm6, 0, %v1322_v19 }
 0xa94   :  { %v1332_v3 = vpack.i.b16 %v1323_v22, %v1304_v18  ;;  %v1334_v26 = vshrl.u32 %v1323_v22, 16  ;;  %2282 = vmatmul.msk.bf16.vlgmr.msrb.gmra.mxu3 %vm574_vm7, %v1326_v16 }
 0xa96   :  { %v1335_v27 = vpack.i.b16 %v1334_v26, %v1333_v2  ;;  %2283 = vmatmul.msk.bf16.vlgmr.msra.gmra.mxu0 %vm574_vm7, %v1329_v21 }
 0xa97   :  { %2284 = vmatmul.msk.bf16.vlgmr.msra.gmra.mxu1 %vm574_vm7, %v1332_v3 }
 0xa99   :  { %v1473_v47 = vpop.permute.xlu2 %1472 }
 0xa9a   :  { %2285 = vmatmul.msk.bf16.vlgmr.msra.gmra.mxu2 %vm574_vm7, %v1335_v27 }
 0xb13   :  { %v1630_v28 = vpop.f32.mrf.mxu0 }
 0xb14   :  { %v1631_v29 = vadd.f32 %v1630_v28, %v2708_v25  ;;  %v1649_v31 = vpop.f32.mrf.mxu1 }
 0xb15   :  { %v1650_v32 = vadd.f32 %v1649_v31, %v2708_v25 }
 0xb16   :  { %v1675_v33 = vsel %vm574_vm7, %v1631_v29, -inf }
 0xb17   :  { %1676 = vmax.xlane.f32.xlu0 %v1675_v33  ;;  %v1611_v34 = vpop.f32.mrf.mxu3  ;;  %v1678_v35 = vsel %vm574_vm7, %v1650_v32, -inf }
 0xb18   :  { %1679 = vmax.xlane.f32.xlu2 %v1678_v35  ;;  %v1612_v36 = vadd.f32 %v1611_v34, %v2708_v25 }
 0xb1a   :  { %v1672_v41 = vsel %vm574_vm7, %v1612_v36, -inf }
 0xb1b   :  { %v1632_v37 = vpop.f32.mrf.mxu0 }
 0xb1c   :  { %v1651_v38 = vpop.f32.mrf.mxu1 }
 0xb1d   :  { %v1668_v39 = vpop.f32.mrf.mxu2 }
 0xb1e   :  { %v1669_v40 = vadd.f32 %v1668_v39, %v2708_v25 }
 0xb1f   :  { %v1613_v42 = vpop.f32.mrf.mxu3  ;;  %1673 = vmax.xlane.f32.xlu0 %v1672_v41 }
 0xb20   :  { %v1681_v43 = vsel %vm574_vm7, %v1669_v40, -inf }
 0xb21   :  { %1682 = vmax.xlane.f32.xlu1 %v1681_v43 }
 0xb25   :  { %v1670_v45 = vpop.f32.mrf.mxu2 }
 0xb30   :  { %1478 = vrot.lane.b32.xlu2 %v1471_v46, %s2490_s1 }
 0xb33   :  { %1476 = vrot.lane.b32.xlu0 %v1469_v44, %s2490_s1 }
 0xb3a   :  { %1480 = vrot.lane.b32.xlu1 %v1473_v47, %s2490_s1 }
 0xb8a   :  { %v1677_v48 = vpop.xlane.xlu0 %1676 }
 0xb8b   :  { %v1680_v25 = vpop.xlane.xlu2 %1679  ;;  %v1685_v58 = vsub.f32 %v1631_v29, %v1677_v48 }
 0xb8c   :  { %v1686_v50 = vsub.f32 %v1650_v32, %v1680_v25 }
 0xb8d   :  { %v1690_v0 = vmul.f32 1.442695, %v1685_v58 }
 0xb8e   :  { %v1692_v52 = vmul.f32 1.442695, %v1686_v50 }
 0xb90   :  { %2416 = vpow2.f32 %v1692_v52 }
 0xb92   :  { %v1674_v53 = vpop.xlane.xlu0 %1673 }
 0xb93   :  { %v1684_v54 = vsub.f32 %v1612_v36, %v1674_v53  ;;  %v1479_v12 = vpop.permute.xlu2 %1478 }
 0xb94   :  { %v1683_v55 = vpop.xlane.xlu1 %1682  ;;  %v1491_v15 = vshrl.u32 %v1479_v12, 16 }
 0xb95   :  { %v1687_v57 = vsub.f32 %v1669_v40, %v1683_v55  ;;  %v1688_v60 = vmul.f32 1.442695, %v1684_v54 }
 0xb96   :  { %v3003_v61 = vpop.eup %2416 }
 0xb97   :  { %v1694_v59 = vmul.f32 1.442695, %v1687_v57  ;;  %2418 = vpow2.f32 %v1688_v60  ;;  %v1702_v62 = vsel %vm574_vm7, %v3003_v61, 0.0 }
 0xb98   :  { %1703 = vadd.xlane.f32.xlu2 %v1702_v62 }
 0xb99   :  { %2420 = vpow2.f32 %v1694_v59 }
 0xb9a   :  { %2422 = vpow2.f32 %v1690_v0 }
 0xb9d   :  { %v3007_v1 = vpop.eup %2418 }
 0xb9e   :  { %v1696_v5 = vsel %vm574_vm7, %v3007_v1, 0.0 }
 0xb9f   :  { %v3009_v4 = vpop.eup %2420  ;;  %1697 = vadd.xlane.f32.xlu0 %v1696_v5 }
 0xba0   :  { %v1705_v63 = vsel %vm574_vm7, %v3009_v4, 0.0  ;;  %v3015_v56 = vpop.eup %2422 }
 0xba1   :  { %1706 = vadd.xlane.f32.xlu1 %v1705_v63  ;;  %v1699_v51 = vsel %vm574_vm7, %v3015_v56, 0.0 }
 0xba5   :  { %v1477_v6 = vpop.permute.xlu0 %1476 }
 0xba6   :  { %v1484_v9 = vpack.i.b16 %v1477_v6, %v1475_v49  ;;  %v1486_v10 = vshrl.u32 %v1477_v6, 16 }
 0xba7   :  { %1700 = vadd.xlane.f32.xlu0 %v1699_v51 }
 0xba8   :  { %v1487_v11 = vpack.i.b16 %v1486_v10, %v1485_v7  ;;  %v1498_v13 = vperm.slane %v1484_v9, %v2636_v8 }
 0xbaa   :  { %v1524_v16 = vperm.slane %v1487_v11, %v2636_v8  ;;  %v1506_v19 = vrot.slane %v1498_v13, 4 }
 0xbac   :  { %v1481_v14 = vpop.permute.xlu1 %1480  ;;  %v1532_v22 = vrot.slane %v1524_v16, 4 }
 0xbad   :  { %v1490_v17 = vpack.i.b16 %v1481_v14, %v1479_v12  ;;  %v1492_v18 = vshrl.u32 %v1481_v14, 16 }
 0xbaf   :  { %v1493_v20 = vpack.i.b16 %v1492_v18, %v1491_v15  ;;  %v1503_v21 = vperm.slane %v1490_v17, %v2636_v8 }
 0xbb1   :  { %v1504_v3 = vrot.slane %v1503_v21, 4  ;;  %v1507_v2 = vsel %vm222_vm6, %v1503_v21, %v1506_v19  ;;  %v1529_v26 = vperm.slane %v1493_v20, %v2636_v8 }
 0xbb2   :  { %v1515_v27 = vperm.slane %v1507_v2, %v2640_v23 }
 0xbb3   :  { %v1505_v28 = vsel %vm222_vm6, %v1504_v3, %v1498_v13  ;;  %v1530_v29 = vrot.slane %v1529_v26, 4  ;;  %v1533_v31 = vsel %vm222_vm6, %v1529_v26, %v1532_v22 }
 0xbb4   :  { %v1511_v32 = vperm.slane %v1505_v28, %v2640_v23  ;;  %v1518_v33 = vrot.slane %v1515_v27, 4  ;;  %v1541_v34 = vperm.slane %v1533_v31, %v2640_v23 }
 0xbb5   :  { %v1531_v35 = vsel %vm222_vm6, %v1530_v29, %v1524_v16 }
 0xbb6   :  { %v1516_v36 = vrot.slane %v1511_v32, 4  ;;  %v1519_v37 = vsel %vm222_vm6, 0, %v1518_v33  ;;  %v1537_v38 = vperm.slane %v1531_v35, %v2640_v23  ;;  %v1544_v39 = vrot.slane %v1541_v34, 4 }
 0xbb7   :  { %v1551_v40 = vrot.slane %v1519_v37, 4  ;;  %v1546_v44 = vsel %vm222_vm6, %v1518_v33, %v1511_v32 }
 0xbb8   :  { %v1517_v41 = vsel %vm222_vm6, 0, %v1516_v36  ;;  %v1542_v42 = vrot.slane %v1537_v38, 4  ;;  %v1545_v43 = vsel %vm222_vm6, 0, %v1544_v39  ;;  %v1565_v49 = vsel %vm222_vm6, %v1544_v39, %v1537_v38 }
 0xbb9   :  { %v1552_v45 = vsel %vm222_vm6, %v1551_v40, %v1517_v41  ;;  %v1570_v46 = vrot.slane %v1545_v43, 4  ;;  %v1550_v50 = vperm.slane %v1546_v44, %v2636_v8  ;;  %v1569_v55 = vperm.slane %v1565_v49, %v2636_v8 }
 0xbba   :  { %v1543_v47 = vsel %vm222_vm6, 0, %v1542_v42  ;;  %v1556_v48 = vperm.slane %v1552_v45, %v2636_v8 }
 0xbbb   :  { %v1571_v25 = vsel %vm222_vm6, %v1570_v46, %v1543_v47 }
 0xbbc   :  { %v1557_v52 = vrot.slane %v1556_v48, 4  ;;  %v1575_v53 = vperm.slane %v1571_v25, %v2636_v8 }
 0xbbe   :  { %v1558_v54 = vsel %vm222_vm6, %v1557_v52, %v1550_v50  ;;  %v1576_v57 = vrot.slane %v1575_v53, 4 }
 0xbbf   :  { %v1562_v58 = vperm.slane %v1558_v54, %v2640_v23 }
 0xbc0   :  { %v1577_v60 = vsel %vm222_vm6, %v1576_v57, %v1569_v55 }
 0xbc1   :  { %v1581_v59 = vperm.slane %v1577_v60, %v2640_v23  ;;  %v1563_v62 = vrot.slane %v1562_v58, 4  ;;  %v1587_v0 = vshrl.u32 %v1562_v58, 16 }
 0xbc3   :  { %v1586_v5 = vpack.i.b16 %v1581_v59, %v1562_v58  ;;  %v1588_v63 = vshrl.u32 %v1581_v59, 16  ;;  %v1564_v6 = vsel %vm222_vm6, 0, %v1563_v62  ;;  %v1582_v7 = vrot.slane %v1581_v59, 4 }
 0xbc4   :  { %v1593_v12 = vshrl.u32 %v1564_v6, 16 }
 0xbc5   :  { %v1776_v9 = vsel %vm754_vm9, %v1586_v5, 0  ;;  %v1589_v10 = vpack.i.b16 %v1588_v63, %v1587_v0  ;;  %v1583_v51 = vsel %vm222_vm6, 0, %v1582_v7 }
 0xbc6   :  { %1785 = vmatpush.bf16.msra.mxu3 %v1776_v9  ;;  %v1592_v11 = vpack.i.b16 %v1583_v51, %v1564_v6  ;;  %v1594_v13 = vshrl.u32 %v1583_v51, 16 }
 0xbc7   :  { %v1795_v14 = vsel %vm754_vm9, %v1589_v10, 0 }
 0xbc8   :  { %1804 = vmatpush.bf16.msrb.mxu0 %v1795_v14  ;;  %v1814_v15 = vsel %vm754_vm9, %v1592_v11, 0  ;;  %v1595_v16 = vpack.i.b16 %v1594_v13, %v1593_v12 }
 0xbc9   :  { %1823 = vmatpush.bf16.msrb.mxu1 %v1814_v15 }
 0xbca   :  { %v1833_v17 = vsel %vm754_vm9, %v1595_v16, 0 }
 0xbcb   :  { %1842 = vmatpush.bf16.msrb.mxu2 %v1833_v17 }
 0xc0b   :  { %v1704_v18 = vpop.xlane.xlu2 %1703 }
 0xc0c   :  { %2424 = vrcp.f32 %v1704_v18  ;;  %v1749_v2 = vand.u32 2147483648, %v1704_v18  ;;  %v1747_v27 = vand.u32 2147483647, %v1704_v18  ;;  %vm1743_vm3 = vweird.f32 %v1704_v18 }
 0xc0e   :  { %v1750_v32 = vor.u32 1.1754944e-38, %v1749_v2  ;;  %vm1748_vm9 = vcmp.eq.f32.partialorder %v1747_v27, 8.507059e+37 }
 0xc12   :  { %v2425_v19 = vpop.eup %2424  ;;  %v1698_v20 = vpop.xlane.xlu0 %1697 }
 0xc13   :  { %v1739_v21 = vmul.f32 %v2425_v19, %v1704_v18  ;;  %2426 = vrcp.f32 %v1698_v20  ;;  %vm1744_vm2 = vweird.f32 %v2425_v19  ;;  %v1719_v40 = vand.u32 2147483648, %v1698_v20 }
 0xc14   :  { %v1707_v22 = vpop.xlane.xlu1 %1706  ;;  %vm1745_vm4 = vmor %vm1743_vm3, %vm1744_vm2  ;;  %v1717_v43 = vand.u32 2147483647, %v1698_v20  ;;  %vm1713_vm10 = vweird.f32 %v1698_v20 }
 0xc15   :  { %2428 = vrcp.f32 %v1707_v22  ;;  %v1740_v3 = vsub.f32 1.0, %v1739_v21  ;;  %v1764_v44 = vand.u32 2147483648, %v1707_v22  ;;  %v1762_v46 = vand.u32 2147483647, %v1707_v22 }
 0xc16   :  { %v1720_v25 = vor.u32 1.1754944e-38, %v1719_v40  ;;  %vm1758_vm13 = vweird.f32 %v1707_v22  ;;  %vm1718_vm0 = vcmp.eq.f32.partialorder %v1717_v43, 8.507059e+37 }
 0xc17   :  { %v1741_v26 = vmul.f32 %v2425_v19, %v1740_v3  ;;  %v1765_v52 = vor.u32 1.1754944e-38, %v1764_v44  ;;  %vm1763_vm3 = vcmp.eq.f32.partialorder %v1762_v46, 8.507059e+37 }
 0xc19   :  { %v2427_v28 = vpop.eup %2426  ;;  %v1742_v29 = vadd.f32 %v2425_v19, %v1741_v26 }
 0xc1a   :  { %v1709_v33 = vmul.f32 %v2427_v28, %v1698_v20  ;;  %v1701_v34 = vpop.xlane.xlu0 %1700  ;;  %vm1714_vm5 = vweird.f32 %v2427_v28 }
 0xc1b   :  { %v2429_v31 = vpop.eup %2428  ;;  %v1746_v35 = vsel %vm1745_vm4, %v2425_v19, %v1742_v29  ;;  %2430 = vrcp.f32 %v1701_v34  ;;  %vm1715_vm12 = vmor %vm1713_vm10, %vm1714_vm5  ;;  %v1734_v62 = vand.u32 2147483648, %v1701_v34  ;;  %v1732_v5 = vand.u32 2147483647, %v1701_v34 }
 0xc1c   :  { %v1754_v36 = vmul.f32 %v2429_v31, %v1707_v22  ;;  %v1751_v37 = vsel %vm1748_vm9, %v1750_v32, %v1746_v35  ;;  %v1710_v38 = vsub.f32 1.0, %v1709_v33  ;;  %vm1759_vm8 = vweird.f32 %v2429_v31 }
 0xc1d   :  { %v1752_v39 = vmul.f32 %v3003_v61, %v1751_v37  ;;  %vm1760_vm2 = vmor %vm1758_vm13, %vm1759_vm8  ;;  %vm1728_vm9 = vweird.f32 %v1701_v34  ;;  %v1735_v9 = vor.u32 1.1754944e-38, %v1734_v62  ;;  %vm1733_vm8 = vcmp.eq.f32.partialorder %v1732_v5, 8.507059e+37 }
 0xc1e   :  { %v1755_v41 = vsub.f32 1.0, %v1754_v36  ;;  %v1711_v42 = vmul.f32 %v2427_v28, %v1710_v38 }
 0xc1f   :  { %v1770_v47 = vpack.c.bf16 %v1752_v39, %v1752_v39 }
 0xc20   :  { %v1756_v45 = vmul.f32 %v2429_v31, %v1755_v41  ;;  %v1712_v48 = vadd.f32 %v2427_v28, %v1711_v42 }
 0xc21   :  { %v2431_v49 = vpop.eup %2430  ;;  %2288 = vmatmul.msk.bf16.vlgmr.msrb.gmra.mxu1 %vm574_vm7, %v1770_v47 }
 0xc22   :  { %v1757_v50 = vadd.f32 %v2429_v31, %v1756_v45  ;;  %v1716_v61 = vsel %vm1715_vm12, %v2427_v28, %v1712_v48  ;;  %v1724_v53 = vmul.f32 %v2431_v49, %v1701_v34  ;;  %vm1729_vm4 = vweird.f32 %v2431_v49 }
 0xc23   :  { %v1721_v54 = vsel %vm1718_vm0, %v1720_v25, %v1716_v61  ;;  %vm1730_vm5 = vmor %vm1728_vm9, %vm1729_vm4 }
 0xc24   :  { %v1761_v55 = vsel %vm1760_vm2, %v2429_v31, %v1757_v50  ;;  %v1722_v57 = vmul.f32 %v3007_v1, %v1721_v54  ;;  %v1725_v60 = vsub.f32 1.0, %v1724_v53 }
 0xc25   :  { %v1766_v58 = vsel %vm1763_vm3, %v1765_v52, %v1761_v55 }
 0xc26   :  { %v1767_v59 = vmul.f32 %v3009_v4, %v1766_v58  ;;  %v1726_v0 = vmul.f32 %v2431_v49, %v1725_v60  ;;  %v1768_v63 = vpack.c.bf16 %v1722_v57, %v1722_v57 }
 0xc28   :  { %v1771_v6 = vpack.c.bf16 %v1767_v59, %v1767_v59  ;;  %v1727_v7 = vadd.f32 %v2431_v49, %v1726_v0  ;;  %2286 = vmatmul.msk.bf16.vlgmr.msra.gmra.mxu3 %vm574_vm7, %v1768_v63 }
 0xc2a   :  { %2289 = vmatmul.msk.bf16.vlgmr.msrb.gmra.mxu2 %vm574_vm7, %v1771_v6  ;;  %v1731_v10 = vsel %vm1730_vm5, %v2431_v49, %v1727_v7 }
 0xc2b   :  { %v1736_v1 = vsel %vm1733_vm8, %v1735_v9, %v1731_v10 }
 0xc2c   :  { %v1737_v51 = vmul.f32 %v3015_v56, %v1736_v1 }
 0xc2e   :  { %v1769_v4 = vpack.c.bf16 %v1737_v51, %v1737_v51 }
 0xc30   :  { %2287 = vmatmul.msk.bf16.vlgmr.msrb.gmra.mxu0 %vm574_vm7, %v1769_v4 }
 0xc9e   :  { %v1825_v11 = vpop.f32.mrf.mxu1 }
 0xc9f   :  { %v1848_v13 = vrot.slane %v1825_v11, 4 }
 0xca6   :  { %v1827_v12 = vpop.f32.mrf.mxu1 }
 0xcab   :  { %v1787_v14 = vpop.f32.mrf.mxu3 }
 0xcac   :  { %v1849_v15 = vsel %vm222_vm6, %v1848_v13, %v1787_v14  ;;  %v1850_v16 = vrot.slane %v1787_v14, 4 }
 0xcad   :  { %v1844_v17 = vpop.f32.mrf.mxu2  ;;  %v1855_v18 = vperm.slane %v1849_v15, %v2636_v8  ;;  %v1806_v20 = vpop.f32.mrf.mxu0 }
 0xcae   :  { %v1860_v19 = vrot.slane %v1844_v17, 4  ;;  %v1851_v21 = vsel %vm222_vm6, %v1825_v11, %v1850_v16  ;;  %v1862_v22 = vrot.slane %v1806_v20, 4 }
 0xcaf   :  { %v1859_v56 = vperm.slane %v1851_v21, %v2636_v8  ;;  %v1874_v3 = vrot.slane %v1855_v18, 4 }
 0xcb0   :  { %v1861_v2 = vsel %vm222_vm6, %v1860_v19, %v1806_v20  ;;  %v1863_v26 = vsel %vm222_vm6, %v1844_v17, %v1862_v22  ;;  %v2360_v20 = vld [vmem:[%s3162_s6 + $0x30] sm:$0xff] }
 0xcb1   :  { %v1867_v27 = vperm.slane %v1861_v2, %v2636_v8  ;;  %v1886_v28 = vrot.slane %v1859_v56, 4  ;;  %v1871_v29 = vperm.slane %v1863_v26, %v2636_v8 }
 0xcb3   :  { %v1872_v31 = vrot.slane %v1867_v27, 4  ;;  %v1875_v32 = vsel %vm222_vm6, %v1867_v27, %v1874_v3  ;;  %v1884_v34 = vrot.slane %v1871_v29, 4  ;;  %v1887_v35 = vsel %vm222_vm6, %v1871_v29, %v1886_v28  ;;  %v1789_v36 = vpop.f32.mrf.mxu3 }
 0xcb4   :  { %v1883_v33 = vperm.slane %v1875_v32, %v2640_v23  ;;  %v1895_v38 = vperm.slane %v1887_v35, %v2640_v23  ;;  %v2366_v35 = vld [vmem:[%s3161_s5 + $0x10] sm:$0xff] }
 0xcb5   :  { %v1873_v37 = vsel %vm222_vm6, %v1872_v31, %v1855_v18  ;;  %v1846_v39 = vpop.f32.mrf.mxu2  ;;  %v1885_v41 = vsel %vm222_vm6, %v1884_v34, %v1859_v56  ;;  %v1808_v43 = vpop.f32.mrf.mxu0  ;;  %v2367_v34 = vld [vmem:[%s3161_s5 + $0x18] sm:$0xff] }
 0xcb6   :  { %v1879_v40 = vperm.slane %v1873_v37, %v2640_v23  ;;  %v1898_v42 = vrot.slane %v1883_v33, 4  ;;  %v1891_v44 = vperm.slane %v1885_v41, %v2640_v23  ;;  %v1902_v45 = vrot.slane %v1895_v38, 4  ;;  %2066 = vmatpush.bf16.msra.mxu0 %v2367_v34 }
 0xcb8   :  { %v1896_v46 = vrot.slane %v1879_v40, 4  ;;  %v1899_v47 = vsel %vm222_vm6, 0.0, %v1898_v42  ;;  %v1904_v48 = vsel %vm222_vm6, %v1898_v42, %v1879_v40  ;;  %v1900_v49 = vrot.slane %v1891_v44, 4 }
 0xcb9   :  { %v1903_v25 = vsel %vm222_vm6, 0.0, %v1902_v45  ;;  %v1908_v50 = vperm.slane %v1904_v48, %v2636_v8  ;;  %v1909_v61 = vrot.slane %v1899_v47, 4  ;;  %v1915_v54 = vsel %vm222_vm6, %v1902_v45, %v1891_v44  ;;  %v2386_v44 = vld [vmem:[%s3159_s3 + $0x3] ss:$0 sm:$0xff] }
 0xcba   :  { %v1897_v52 = vsel %vm222_vm6, 0.0, %v1896_v46  ;;  %v1920_v53 = vrot.slane %v1903_v25, 4  ;;  %v1901_v55 = vsel %vm222_vm6, 0.0, %v1900_v49  ;;  %v1919_v58 = vperm.slane %v1915_v54, %v2636_v8  ;;  %2067 = vmatpush.bf16.msra.mxu0 %v2366_v35  ;;  %v2365_v49 = vld [vmem:[%s3162_s6 + $0x58] sm:$0xff]  ;;  %v2364_v25 = vld [vmem:[%s3162_s6 + $0x50] sm:$0xff] }
 0xcbb   :  { %v1910_v57 = vsel %vm222_vm6, %v1909_v61, %v1897_v52  ;;  %v1928_v60 = vrot.slane %v1908_v50, 4  ;;  %2130 = vmatpush.bf16.msra.mxu1 %v2365_v49 }
 0xcbc   :  { %v1914_v59 = vperm.slane %v1910_v57, %v2636_v8  ;;  %v1921_v62 = vsel %vm222_vm6, %v1920_v53, %v1901_v55  ;;  %v1940_v5 = vrot.slane %v1919_v58, 4  ;;  %v2362_v57 = vld [vmem:[%s3162_s6 + $0x40] sm:$0xff] }
 0xcbd   :  { %v1925_v0 = vperm.slane %v1921_v62, %v2636_v8 }
 0xcbe   :  { %v1929_v63 = vsel %vm222_vm6, %v1914_v59, %v1928_v60  ;;  %v1926_v6 = vrot.slane %v1914_v59, 4 }
 0xcbf   :  { %v1937_v7 = vperm.slane %v1929_v63, %v2640_v23  ;;  %v1941_v9 = vsel %vm222_vm6, %v1925_v0, %v1940_v5  ;;  %v1938_v10 = vrot.slane %v1925_v0, 4  ;;  %2131 = vmatpush.bf16.msra.mxu1 %v2364_v25 }
 0xcc0   :  { %v1949_v1 = vperm.slane %v1941_v9, %v2640_v23  ;;  %v1927_v51 = vsel %vm222_vm6, %v1926_v6, %v1908_v50  ;;  %v2363_v50 = vld [vmem:[%s3162_s6 + $0x48] sm:$0xff] }
 0xcc1   :  { %v1956_v4 = vrot.slane %v1937_v7, 4  ;;  %v1933_v11 = vperm.slane %v1927_v51, %v2640_v23  ;;  %v1939_v12 = vsel %vm222_vm6, %v1938_v10, %v1919_v58 }
 0xcc2   :  { %v1954_v13 = vrot.slane %v1949_v1, 4  ;;  %v1945_v8 = vperm.slane %v1939_v12, %v2640_v23  ;;  %v2361_v23 = vld [vmem:[%s3162_s6 + $0x38] sm:$0xff] }
 0xcc3   :  { %v1957_v14 = vsel %vm222_vm6, %v1949_v1, %v1956_v4  ;;  %v1952_v15 = vrot.slane %v1933_v11, 4  ;;  %2008 = vmatpush.bf16.msrb.mxu3 %v2361_v23  ;;  %2132 = vmatpush.bf16.msra.mxu1 %v2363_v50 }
 0xcc4   :  { %1967 = vrot.lane.b32.xlu2 %v1957_v14, %s2494_s0  ;;  %v1955_v16 = vsel %vm222_vm6, %v1954_v13, %v1937_v7  ;;  %v1950_v17 = vrot.slane %v1945_v8, 4 }
 0xcc5   :  { %1963 = vrot.lane.b32.xlu0 %v1955_v16, %s2495_s15  ;;  %v1953_v18 = vsel %vm222_vm6, %v1945_v8, %v1952_v15 }
 0xcc6   :  { %1959 = vrot.lane.b32.xlu1 %v1953_v18, %s2496_s16  ;;  %v1951_v19 = vsel %vm222_vm6, %v1950_v17, %v1933_v11 }
 0xcc7   :  { %2009 = vmatpush.bf16.msrb.mxu3 %v2360_v20  ;;  %2133 = vmatpush.bf16.msra.mxu1 %v2362_v57 }
 0xd1e   :  { %v1968_v3 = vpop.permute.xlu2 %1967 }
 0xd37   :  { %v1964_v22 = vpop.permute.xlu0 %1963 }
 0xd38   :  { %v1960_v21 = vpop.permute.xlu1 %1959 }
 0xd39   :  { %v1970_v56 = vsel %vm574_vm7, %v1951_v19, %v1960_v21 }
 0xd3a   :  { %v1971_v2 = vsel %vm952_vm14, %v1970_v56, %v1964_v22  ;;  %v2387_v56 = vld [vmem:[%s3159_s3 + $0x4] ss:$0 sm:$0xff] }
 0xd3b   :  { %v1972_v26 = vsel %vm954_vm15, %v1971_v2, %v1968_v3 }
 0xd3c   :  { %v1986_v27 = vpack.c.bf16 %v1972_v26, %v1972_v26 }
 0xd3e   :  { %2310 = vmatmul.msk.bf16.vlgmr.msrb.gmra.mxu3 %vm87_vm1, %v1986_v27 }
 0xdc1   :  { %v2011_v28 = vpop.f32.mrf.mxu3 }
 0xdc2   :  { %v3115_v29 = vadd.f32 %v2011_v28, %v2864_v24 }
 0xdc4   :  { %v2018_v31 = vmul.f32 %v3115_v29, %v3115_v29 }
 0xdc6   :  { %v2019_v32 = vsel %vm87_vm1, %v2018_v31, 0.0 }
 0xdc7   :  { %2020 = vadd.xlane.f32.xlu0 %v2019_v32 }
 0xdc9   :  { %v2013_v33 = vpop.f32.mrf.mxu3 }
 0xe3a   :  { %v2021_v36 = vpop.xlane.xlu0 %2020 }
 0xe3b   :  { %v2022_v24 = vmul.f32 %v2021_v36, %v2601_v30 }
 0xe3d   :  { %v2023_v37 = vadd.f32 1e-06, %v2022_v24 }
 0xe3f   :  { %2432 = vrsqrt.f32 %v2023_v37  ;;  %vm2030_vm7 = vweird.f32 %v2023_v37 }
 0xe45   :  { %v2433_v38 = vpop.eup %2432 }
 0xe46   :  { %v2025_v39 = vmul.f32 %v2433_v38, %v2023_v37  ;;  %vm2031_vm6 = vweird.f32 %v2433_v38 }
 0xe47   :  { %vm2032_vm14 = vmor %vm2030_vm7, %vm2031_vm6 }
 0xe48   :  { %v2026_v40 = vmul.f32 %v2433_v38, %v2025_v39 }
 0xe4a   :  { %v2027_v41 = vmul.f32 0.5, %v2026_v40 }
 0xe4c   :  { %v2028_v42 = vsub.f32 1.5, %v2027_v41 }
 0xe4e   :  { %v2029_v43 = vmul.f32 %v2433_v38, %v2028_v42 }
 0xe50   :  { %v2033_v45 = vsel %vm2032_vm14, %v2433_v38, %v2029_v43 }
 0xe51   :  { %v2034_v46 = vmul.f32 %v2033_v45, %v3115_v29 }
 0xe53   :  { %v2038_v47 = vmul.f32 %v2386_v44, %v2034_v46 }
 0xe55   :  { %v2039_v48 = vpack.c.bf16 %v2038_v47, %v2038_v47 }
 0xe57   :  { %2324 = vmatmul.msk.bf16.vlgmr.msra.gmra.mxu0 %vm87_vm1, %v2039_v48 }
 0xed4   :  { %v2069_v61 = vpop.f32.mrf.mxu0 }
 0xed5   :  { %2094 = vrot.lane.b32.xlu1 %v2069_v61, %s2490_s1  ;;  %v2325_v53 = vmul.f32 -1.442695, %v2069_v61 }
 0xed7   :  { %2434 = vpow2.f32 %v2325_v53 }
 0xedc   :  { %v2071_v52 = vpop.f32.mrf.mxu0 }
 0xedd   :  { %v2435_v54 = vpop.eup %2434 }
 0xede   :  { %v2076_v55 = vadd.f32 1.0, %v2435_v54 }
 0xee0   :  { %2436 = vrcp.f32 %v2076_v55  ;;  %v2088_v5 = vand.u32 2147483648, %v2076_v55  ;;  %vm2082_vm10 = vweird.f32 %v2076_v55  ;;  %v2086_v63 = vand.u32 2147483647, %v2076_v55 }
 0xee2   :  { %v2089_v7 = vor.u32 1.1754944e-38, %v2088_v5  ;;  %vm2087_vm13 = vcmp.eq.f32.partialorder %v2086_v63, 8.507059e+37 }
 0xee6   :  { %v2437_v58 = vpop.eup %2436 }
 0xee7   :  { %v2078_v60 = vmul.f32 %v2437_v58, %v2076_v55  ;;  %vm2083_vm15 = vweird.f32 %v2437_v58 }
 0xee8   :  { %vm2084_vm12 = vmor %vm2082_vm10, %vm2083_vm15 }
 0xee9   :  { %v2079_v59 = vsub.f32 1.0, %v2078_v60 }
 0xeeb   :  { %v2080_v62 = vmul.f32 %v2437_v58, %v2079_v59 }
 0xeed   :  { %v2081_v0 = vadd.f32 %v2437_v58, %v2080_v62 }
 0xeef   :  { %v2085_v6 = vsel %vm2084_vm12, %v2437_v58, %v2081_v0 }
 0xef0   :  { %v2090_v9 = vsel %vm2087_vm13, %v2089_v7, %v2085_v6 }
 0xef1   :  { %v2092_v10 = vmul.f32 %v2090_v9, %v2069_v61 }
 0xf47   :  { %v2095_v1 = vpop.permute.xlu1 %2094 }
 0xf48   :  { %v2097_v51 = vmul.f32 %v2095_v1, %v2092_v10 }
 0xf4a   :  { %v2098_v4 = vpack.c.bf16 %v2097_v51, %v2097_v51 }
 0xf4c   :  { %2342 = vmatmul.msk.bf16.vlgmr.msra.gmra.mxu1 %vm1104_vm11, %v2098_v4 }
 0xfc9   :  { %v2135_v11 = vpop.f32.mrf.mxu1 }
 0xfca   :  { %v2139_v12 = vadd.f32 %v2135_v11, %v3115_v29 }
 0xfcc   :  { %v2142_v13 = vmul.f32 %v2139_v12, %v2139_v12 }
 0xfce   :  { %v2143_v8 = vsel %vm87_vm1, %v2142_v13, 0.0 }
 0xfcf   :  { %2144 = vadd.xlane.f32.xlu1 %v2143_v8 }
 0xfd1   :  { %v2137_v14 = vpop.f32.mrf.mxu1 }
0x1042   :  { %v2145_v15 = vpop.xlane.xlu1 %2144 }
0x1043   :  { %v2146_v16 = vmul.f32 %v2145_v15, %v2601_v30 }
0x1045   :  { %v2147_v17 = vadd.f32 1e-06, %v2146_v16 }
0x1047   :  { %2438 = vrsqrt.f32 %v2147_v17  ;;  %vm2154_vm11 = vweird.f32 %v2147_v17 }
0x104d   :  { %v2439_v18 = vpop.eup %2438 }
0x104e   :  { %v2149_v19 = vmul.f32 %v2439_v18, %v2147_v17  ;;  %vm2155_vm0 = vweird.f32 %v2439_v18 }
0x104f   :  { %vm2156_vm2 = vmor %vm2154_vm11, %vm2155_vm0 }
0x1050   :  { %v2150_v23 = vmul.f32 %v2439_v18, %v2149_v19 }
0x1052   :  { %v2151_v20 = vmul.f32 0.5, %v2150_v23 }
0x1054   :  { %v2152_v21 = vsub.f32 1.5, %v2151_v20 }
0x1056   :  { %v2153_v22 = vmul.f32 %v2439_v18, %v2152_v21 }
0x1058   :  { %v2157_v3 = vsel %vm2156_vm2, %v2439_v18, %v2153_v22 }
0x1059   :  { %v2158_v30 = vmul.f32 %v2157_v3, %v2139_v12 }
0x105b   :  { %v2162_v2 = vmul.f32 %v2387_v56, %v2158_v30 }
0x105d   :  { %2163 = vst.msk [vmem:[#allocation5] sm:$0xff] %vm87_vm1, %v2162_v2 }
0x105e   :  { %2174 = dma.vmem_to_hbm [thread:$0]  %s2170_s17, 128, %s2172_s20, [#allocation6]  }
0x105f   :  { %2481 = dma.done.wait [#allocation6], 128  }
0x1060   :  { %2482 = vsyncadd [#allocation6], 4294967168 }
0x1061   :  { %2179 = vsyncpa [#allocation6], 1 }

</bundles_post_ra>
